<compile_context>
chip_gen: v7x
topology: tpu7x:2x2x1
jax: 0.10.0
libtpu: 0.0.40
codegen_flags: <defaults>
</compile_context>

<pallas_src>
import functools

import jax
import jax.numpy as jnp
from jax import lax
from jax.experimental import pallas as pl
from jax.experimental.pallas import tpu as pltpu

# VICReg hyper-parameters (baked into the kernel, same as the original run).
SIM_COEFF = 25.0
STD_COEFF = 25.0
COV_COEFF = 1.0
_EPS = 1e-4


def _vicreg_kernel(x_ref, y_ref, out_ref,
                   gram_x, gram_y, sum_x, sum_y, sumsq_x, sumsq_y, sumd2,
                   *, batch_size):
    step = pl.program_id(0)
    nsteps = pl.num_programs(0)

    # ---- zero accumulators on the first batch tile --------------------------
    @pl.when(step == 0)
    def _init():
        gram_x[...] = jnp.zeros_like(gram_x)
        gram_y[...] = jnp.zeros_like(gram_y)
        sum_x[...] = jnp.zeros_like(sum_x)
        sum_y[...] = jnp.zeros_like(sum_y)
        sumsq_x[...] = jnp.zeros_like(sumsq_x)
        sumsq_y[...] = jnp.zeros_like(sumsq_y)
        sumd2[...] = jnp.zeros_like(sumd2)

    x = x_ref[...]                       # (tb, D), native dtype -> feed MXU as-is
    y = y_ref[...]
    xf = x.astype(jnp.float32)           # elementwise statistics in f32
    yf = y.astype(jnp.float32)
    tb = x.shape[0]

    # ---- MXU: uncentered Gram accumulators (X^T X, Y^T Y), f32 accumulate ---
    gram_dims = (((0,), (0,)), ((), ()))
    gram_x[...] += lax.dot_general(x, x, gram_dims,
                                   preferred_element_type=jnp.float32)
    gram_y[...] += lax.dot_general(y, y, gram_dims,
                                   preferred_element_type=jnp.float32)

    # ---- MXU: batch-axis sums via a ones-row matmul (keeps the XLU free) ----
    row_dims = (((1,), (0,)), ((), ()))              # (1, tb) @ (tb, D) -> (1, D)
    ones_in = jnp.ones((1, tb), dtype=x.dtype)
    ones_f32 = jnp.ones((1, tb), dtype=jnp.float32)
    sum_x[...] += lax.dot_general(ones_in, x, row_dims,
                                  preferred_element_type=jnp.float32)
    sum_y[...] += lax.dot_general(ones_in, y, row_dims,
                                  preferred_element_type=jnp.float32)

    d = xf - yf
    sumsq_x[...] += lax.dot_general(ones_f32, xf * xf, row_dims,
                                    preferred_element_type=jnp.float32)
    sumsq_y[...] += lax.dot_general(ones_f32, yf * yf, row_dims,
                                    preferred_element_type=jnp.float32)
    sumd2[...] += lax.dot_general(ones_f32, d * d, row_dims,
                                  preferred_element_type=jnp.float32)

    # ---- finalize on the last batch tile ------------------------------------
    @pl.when(step == nsteps - 1)
    def _finalize():
        feat = gram_x.shape[0]
        b = float(batch_size)
        inv_b = 1.0 / b                    # hoisted Python constants: no EUP/VPU
        inv_bm1 = 1.0 / (b - 1.0)          # divides emitted per tile
        inv_d = 1.0 / float(feat)

        s_x = sum_x[...]                   # (1, D)
        s_y = sum_y[...]
        mu_x = s_x * inv_b
        mu_y = s_y * inv_b

        # unbiased per-feature variance (== diag of the centered covariance)
        var_x = (sumsq_x[...] - s_x * mu_x) * inv_bm1
        var_y = (sumsq_y[...] - s_y * mu_y) * inv_bm1
        std_x = jnp.sqrt(var_x + _EPS)
        std_y = jnp.sqrt(var_y + _EPS)
        std_loss = (jnp.sum(jnp.maximum(1.0 - std_x, 0.0)) +
                    jnp.sum(jnp.maximum(1.0 - std_y, 0.0))) * (0.5 * inv_d)

        # centered covariance: cov = (G - s s^T / B) / (B - 1)
        outer_dims = (((0,), (0,)), ((), ()))        # (1,D) x (1,D) -> (D,D) outer
        cov_x = (gram_x[...]
                 - lax.dot_general(s_x, s_x, outer_dims,
                                   preferred_element_type=jnp.float32) * inv_b
                 ) * inv_bm1
        cov_y = (gram_y[...]
                 - lax.dot_general(s_y, s_y, outer_dims,
                                   preferred_element_type=jnp.float32) * inv_b
                 ) * inv_bm1

        # off-diagonal sum of squares = ||cov||_F^2 - sum(diag(cov)^2); diag == var
        cov_loss = ((jnp.sum(cov_x * cov_x) - jnp.sum(var_x * var_x)) +
                    (jnp.sum(cov_y * cov_y) - jnp.sum(var_y * var_y))) * inv_d

        # invariance (MSE) loss
        repr_loss = jnp.sum(sumd2[...]) * (inv_b * inv_d)

        out_ref[0, 0] = (SIM_COEFF * repr_loss + STD_COEFF * std_loss
                         + COV_COEFF * cov_loss)


def _pick_batch_tile(batch, feat, itemsize, budget_bytes=16 * 1024 * 1024):
    """Largest sublane-aligned batch tile that divides B and keeps the
    double-buffered input footprint (2 inputs x 2 buffers) under budget."""
    for t in (512, 256, 128, 64, 32, 16, 8):
        if batch % t == 0 and 2 * 2 * t * feat * itemsize <= budget_bytes:
            return t
    return batch  # full-batch block (always a legal block shape)


def vicreg_loss(x, y, *, batch_tile=None):
    """VICReg loss. x, y: (B, D) float arrays. Returns scalar float32."""
    assert x.shape == y.shape and x.ndim == 2
    B, D = x.shape
    assert B >= 2, "unbiased variance requires batch >= 2"

    itemsize = x.dtype.itemsize
    if batch_tile is None:
        batch_tile = _pick_batch_tile(B, D, itemsize)
    assert B % batch_tile == 0
    n_tiles = B // batch_tile

    # VMEM budget: streamed input blocks (double-buffered) + (D, D) Gram
    # accumulators + small (1, D) vectors; clamp to a portable 64 MiB.
    vmem_bytes = (2 * 2 * batch_tile * D * itemsize
                  + 2 * D * D * 4 + 5 * D * 4 + (1 << 16))
    vmem_limit = int(min(max(2 * vmem_bytes, 32 * 1024 * 1024),
                         64 * 1024 * 1024))

    cost = pl.CostEstimate(
        flops=int(2 * 2 * B * D * D + 12 * B * D + 4 * D * D),
        transcendentals=int(2 * D),
        bytes_accessed=int(2 * B * D * itemsize + 4),
    )

    grid_spec = pltpu.PrefetchScalarGridSpec(
        num_scalar_prefetch=0,
        grid=(n_tiles,),
        in_specs=[
            pl.BlockSpec((batch_tile, D), lambda i: (i, 0)),
            pl.BlockSpec((batch_tile, D), lambda i: (i, 0)),
        ],
        out_specs=pl.BlockSpec(memory_space=pltpu.SMEM),   # (1,1) scalar result
        scratch_shapes=[
            pltpu.VMEM((D, D), jnp.float32),   # gram_x
            pltpu.VMEM((D, D), jnp.float32),   # gram_y
            pltpu.VMEM((1, D), jnp.float32),   # sum_x
            pltpu.VMEM((1, D), jnp.float32),   # sum_y
            pltpu.VMEM((1, D), jnp.float32),   # sumsq_x
            pltpu.VMEM((1, D), jnp.float32),   # sumsq_y
            pltpu.VMEM((1, D), jnp.float32),   # sum (x - y)^2 per feature
        ],
    )

    out = pl.pallas_call(
        functools.partial(_vicreg_kernel, batch_size=B),
        out_shape=jax.ShapeDtypeStruct((1, 1), jnp.float32),
        grid_spec=grid_spec,
        compiler_params=pltpu.CompilerParams(
            dimension_semantics=("arbitrary",),   # batch axis is a reduction
            vmem_limit_bytes=vmem_limit,
        ),
        cost_estimate=cost,
    )(x, y)
    return out[0, 0]


def _vicreg_ref(x, y):
    """Pure-JAX reference mirroring the PyTorch module (two-pass centering)."""
    B, D = x.shape
    x = x.astype(jnp.float32)
    y = y.astype(jnp.float32)
    repr_loss = jnp.mean((x - y) ** 2)
    xc = x - x.mean(axis=0)
    yc = y - y.mean(axis=0)
    std_x = jnp.sqrt(xc.var(axis=0, ddof=1) + _EPS)
    std_y = jnp.sqrt(yc.var(axis=0, ddof=1) + _EPS)
    std_loss = (jnp.mean(jax.nn.relu(1 - std_x)) / 2
                + jnp.mean(jax.nn.relu(1 - std_y)) / 2)
    cov_x = xc.T @ xc / (B - 1)
    cov_y = yc.T @ yc / (B - 1)
    off = ~jnp.eye(D, dtype=bool)
    cov_loss = (jnp.sum(jnp.where(off, cov_x ** 2, 0.0)) / D
                + jnp.sum(jnp.where(off, cov_y ** 2, 0.0)) / D)
    return SIM_COEFF * repr_loss + STD_COEFF * std_loss + COV_COEFF * cov_loss


if __name__ == "__main__":
    key = jax.random.PRNGKey(0)
    kx, ky = jax.random.split(key)
    # Small embedding batch: B=32 samples, D=128 features; batch_tile=8 gives a
    # 4-step streaming grid so init / accumulate / finalize are all exercised.
    B, D = 32, 128
    x = jax.random.normal(kx, (B, D), dtype=jnp.float32)
    y = jax.random.normal(ky, (B, D), dtype=jnp.float32)

    loss = jax.block_until_ready(vicreg_loss(x, y, batch_tile=8))
    ref = jax.block_until_ready(_vicreg_ref(x, y))
    assert jnp.allclose(loss, ref, rtol=1e-4, atol=1e-4), (loss, ref)
    print("KERNEL_OK")
</pallas_src>

<mosaic_0001>
module attributes {stable_mosaic.version = 11 : i64} {
  func.func @_vicreg_kernel(%arg0: i32, %arg1: memref<8x128xf32, #tpu.memory_space<vmem>>, %arg2: memref<8x128xf32, #tpu.memory_space<vmem>>, %arg3: memref<1x1xf32, #tpu.memory_space<smem>>, %arg4: memref<128x128xf32, #tpu.memory_space<vmem>>, %arg5: memref<128x128xf32, #tpu.memory_space<vmem>>, %arg6: memref<1x128xf32, #tpu.memory_space<vmem>>, %arg7: memref<1x128xf32, #tpu.memory_space<vmem>>, %arg8: memref<1x128xf32, #tpu.memory_space<vmem>>, %arg9: memref<1x128xf32, #tpu.memory_space<vmem>>, %arg10: memref<1x128xf32, #tpu.memory_space<vmem>>) attributes {dimension_semantics = [#tpu.dimension_semantics<arbitrary>], iteration_bounds = array<i64: 4>, scalar_prefetch = 0 : i64, scratch_operands = 7 : i64, tpu.core_type = #tpu.core_type<tc>, window_params = [{transform_indices = @transform_0, window_bounds = array<i64: 8, 128>}, {transform_indices = @transform_1, window_bounds = array<i64: 8, 128>}, {transform_indices = @transform_2, window_bounds = array<i64: 1, 1>}]} {
    %c0_i32 = arith.constant 0 : i32
    %0 = arith.cmpi eq, %arg0, %c0_i32 : i32
    %1 = arith.extui %0 : i1 to i32
    %c0_i32_0 = arith.constant 0 : i32
    %2 = arith.cmpi ne, %1, %c0_i32_0 : i32
    scf.if %2 {
      %cst_41 = arith.constant 0.000000e+00 : f32
      %42 = vector.broadcast %cst_41 : f32 to vector<128x128xf32>
      %c0_42 = arith.constant 0 : index
      %c0_43 = arith.constant 0 : index
      %43 = vector.load %arg4[%c0_42, %c0_43] : memref<128x128xf32, #tpu.memory_space<vmem>>, vector<128x128xf32>
      tpu.vector_store %arg4[%c0_42, %c0_43], %42 {strides = array<i32>} : memref<128x128xf32, #tpu.memory_space<vmem>>, vector<128x128xf32>,
      %cst_44 = arith.constant 0.000000e+00 : f32
      %44 = vector.broadcast %cst_44 : f32 to vector<128x128xf32>
      %c0_45 = arith.constant 0 : index
      %c0_46 = arith.constant 0 : index
      %45 = vector.load %arg5[%c0_45, %c0_46] : memref<128x128xf32, #tpu.memory_space<vmem>>, vector<128x128xf32>
      tpu.vector_store %arg5[%c0_45, %c0_46], %44 {strides = array<i32>} : memref<128x128xf32, #tpu.memory_space<vmem>>, vector<128x128xf32>,
      %cst_47 = arith.constant 0.000000e+00 : f32
      %46 = vector.broadcast %cst_47 : f32 to vector<1x128xf32>
      %c0_48 = arith.constant 0 : index
      %c0_49 = arith.constant 0 : index
      %47 = vector.load %arg6[%c0_48, %c0_49] : memref<1x128xf32, #tpu.memory_space<vmem>>, vector<1x128xf32>
      tpu.vector_store %arg6[%c0_48, %c0_49], %46 {strides = array<i32>} : memref<1x128xf32, #tpu.memory_space<vmem>>, vector<1x128xf32>,
      %cst_50 = arith.constant 0.000000e+00 : f32
      %48 = vector.broadcast %cst_50 : f32 to vector<1x128xf32>
      %c0_51 = arith.constant 0 : index
      %c0_52 = arith.constant 0 : index
      %49 = vector.load %arg7[%c0_51, %c0_52] : memref<1x128xf32, #tpu.memory_space<vmem>>, vector<1x128xf32>
      tpu.vector_store %arg7[%c0_51, %c0_52], %48 {strides = array<i32>} : memref<1x128xf32, #tpu.memory_space<vmem>>, vector<1x128xf32>,
      %cst_53 = arith.constant 0.000000e+00 : f32
      %50 = vector.broadcast %cst_53 : f32 to vector<1x128xf32>
      %c0_54 = arith.constant 0 : index
      %c0_55 = arith.constant 0 : index
      %51 = vector.load %arg8[%c0_54, %c0_55] : memref<1x128xf32, #tpu.memory_space<vmem>>, vector<1x128xf32>
      tpu.vector_store %arg8[%c0_54, %c0_55], %50 {strides = array<i32>} : memref<1x128xf32, #tpu.memory_space<vmem>>, vector<1x128xf32>,
      %cst_56 = arith.constant 0.000000e+00 : f32
      %52 = vector.broadcast %cst_56 : f32 to vector<1x128xf32>
      %c0_57 = arith.constant 0 : index
      %c0_58 = arith.constant 0 : index
      %53 = vector.load %arg9[%c0_57, %c0_58] : memref<1x128xf32, #tpu.memory_space<vmem>>, vector<1x128xf32>
      tpu.vector_store %arg9[%c0_57, %c0_58], %52 {strides = array<i32>} : memref<1x128xf32, #tpu.memory_space<vmem>>, vector<1x128xf32>,
      %cst_59 = arith.constant 0.000000e+00 : f32
      %54 = vector.broadcast %cst_59 : f32 to vector<1x128xf32>
      %c0_60 = arith.constant 0 : index
      %c0_61 = arith.constant 0 : index
      %55 = vector.load %arg10[%c0_60, %c0_61] : memref<1x128xf32, #tpu.memory_space<vmem>>, vector<1x128xf32>
      tpu.vector_store %arg10[%c0_60, %c0_61], %54 {strides = array<i32>} : memref<1x128xf32, #tpu.memory_space<vmem>>, vector<1x128xf32>,
    } else {
    }
    %c0 = arith.constant 0 : index
    %c0_1 = arith.constant 0 : index
    %3 = vector.load %arg1[%c0, %c0_1] : memref<8x128xf32, #tpu.memory_space<vmem>>, vector<8x128xf32>
    %c0_2 = arith.constant 0 : index
    %c0_3 = arith.constant 0 : index
    %4 = vector.load %arg2[%c0_2, %c0_3] : memref<8x128xf32, #tpu.memory_space<vmem>>, vector<8x128xf32>
    %c0_4 = arith.constant 0 : index
    %c0_5 = arith.constant 0 : index
    %5 = vector.load %arg4[%c0_4, %c0_5] : memref<128x128xf32, #tpu.memory_space<vmem>>, vector<128x128xf32>
    %cst = arith.constant dense<0.000000e+00> : vector<128x128xf32>
    %6 = tpu.matmul %3, %3, %cst {dimension_numbers = #tpu.dot_dimension_numbers<[0], [0], [1], [1], [0, 1, 1, 1], [], []>} : vector<8x128xf32>, vector<8x128xf32>, vector<128x128xf32> -> vector<128x128xf32>
    %7 = arith.addf %5, %6 : vector<128x128xf32>
    %c0_6 = arith.constant 0 : index
    %c0_7 = arith.constant 0 : index
    %8 = vector.load %arg4[%c0_6, %c0_7] : memref<128x128xf32, #tpu.memory_space<vmem>>, vector<128x128xf32>
    tpu.vector_store %arg4[%c0_6, %c0_7], %7 {strides = array<i32>} : memref<128x128xf32, #tpu.memory_space<vmem>>, vector<128x128xf32>,
    %c0_8 = arith.constant 0 : index
    %c0_9 = arith.constant 0 : index
    %9 = vector.load %arg5[%c0_8, %c0_9] : memref<128x128xf32, #tpu.memory_space<vmem>>, vector<128x128xf32>
    %cst_10 = arith.constant dense<0.000000e+00> : vector<128x128xf32>
    %10 = tpu.matmul %4, %4, %cst_10 {dimension_numbers = #tpu.dot_dimension_numbers<[0], [0], [1], [1], [0, 1, 1, 1], [], []>} : vector<8x128xf32>, vector<8x128xf32>, vector<128x128xf32> -> vector<128x128xf32>
    %11 = arith.addf %9, %10 : vector<128x128xf32>
    %c0_11 = arith.constant 0 : index
    %c0_12 = arith.constant 0 : index
    %12 = vector.load %arg5[%c0_11, %c0_12] : memref<128x128xf32, #tpu.memory_space<vmem>>, vector<128x128xf32>
    tpu.vector_store %arg5[%c0_11, %c0_12], %11 {strides = array<i32>} : memref<128x128xf32, #tpu.memory_space<vmem>>, vector<128x128xf32>,
    %cst_13 = arith.constant 1.000000e+00 : f32
    %13 = vector.broadcast %cst_13 : f32 to vector<1x8xf32>
    %cst_14 = arith.constant 1.000000e+00 : f32
    %14 = vector.broadcast %cst_14 : f32 to vector<1x8xf32>
    %c0_15 = arith.constant 0 : index
    %c0_16 = arith.constant 0 : index
    %15 = vector.load %arg6[%c0_15, %c0_16] : memref<1x128xf32, #tpu.memory_space<vmem>>, vector<1x128xf32>
    %cst_17 = arith.constant dense<0.000000e+00> : vector<1x128xf32>
    %16 = tpu.matmul %13, %3, %cst_17 {dimension_numbers = #tpu.dot_dimension_numbers<[1], [0], [0], [1], [0, 0, 1, 1], [], []>} : vector<1x8xf32>, vector<8x128xf32>, vector<1x128xf32> -> vector<1x128xf32>
    %17 = arith.addf %15, %16 : vector<1x128xf32>
    %c0_18 = arith.constant 0 : index
    %c0_19 = arith.constant 0 : index
    %18 = vector.load %arg6[%c0_18, %c0_19] : memref<1x128xf32, #tpu.memory_space<vmem>>, vector<1x128xf32>
    tpu.vector_store %arg6[%c0_18, %c0_19], %17 {strides = array<i32>} : memref<1x128xf32, #tpu.memory_space<vmem>>, vector<1x128xf32>,
    %c0_20 = arith.constant 0 : index
    %c0_21 = arith.constant 0 : index
    %19 = vector.load %arg7[%c0_20, %c0_21] : memref<1x128xf32, #tpu.memory_space<vmem>>, vector<1x128xf32>
    %cst_22 = arith.constant dense<0.000000e+00> : vector<1x128xf32>
    %20 = tpu.matmul %13, %4, %cst_22 {dimension_numbers = #tpu.dot_dimension_numbers<[1], [0], [0], [1], [0, 0, 1, 1], [], []>} : vector<1x8xf32>, vector<8x128xf32>, vector<1x128xf32> -> vector<1x128xf32>
    %21 = arith.addf %19, %20 : vector<1x128xf32>
    %c0_23 = arith.constant 0 : index
    %c0_24 = arith.constant 0 : index
    %22 = vector.load %arg7[%c0_23, %c0_24] : memref<1x128xf32, #tpu.memory_space<vmem>>, vector<1x128xf32>
    tpu.vector_store %arg7[%c0_23, %c0_24], %21 {strides = array<i32>} : memref<1x128xf32, #tpu.memory_space<vmem>>, vector<1x128xf32>,
    %23 = arith.subf %3, %4 : vector<8x128xf32>
    %c0_25 = arith.constant 0 : index
    %c0_26 = arith.constant 0 : index
    %24 = vector.load %arg8[%c0_25, %c0_26] : memref<1x128xf32, #tpu.memory_space<vmem>>, vector<1x128xf32>
    %25 = arith.mulf %3, %3 : vector<8x128xf32>
    %cst_27 = arith.constant dense<0.000000e+00> : vector<1x128xf32>
    %26 = tpu.matmul %14, %25, %cst_27 {dimension_numbers = #tpu.dot_dimension_numbers<[1], [0], [0], [1], [0, 0, 1, 1], [], []>} : vector<1x8xf32>, vector<8x128xf32>, vector<1x128xf32> -> vector<1x128xf32>
    %27 = arith.addf %24, %26 : vector<1x128xf32>
    %c0_28 = arith.constant 0 : index
    %c0_29 = arith.constant 0 : index
    %28 = vector.load %arg8[%c0_28, %c0_29] : memref<1x128xf32, #tpu.memory_space<vmem>>, vector<1x128xf32>
    tpu.vector_store %arg8[%c0_28, %c0_29], %27 {strides = array<i32>} : memref<1x128xf32, #tpu.memory_space<vmem>>, vector<1x128xf32>,
    %c0_30 = arith.constant 0 : index
    %c0_31 = arith.constant 0 : index
    %29 = vector.load %arg9[%c0_30, %c0_31] : memref<1x128xf32, #tpu.memory_space<vmem>>, vector<1x128xf32>
    %30 = arith.mulf %4, %4 : vector<8x128xf32>
    %cst_32 = arith.constant dense<0.000000e+00> : vector<1x128xf32>
    %31 = tpu.matmul %14, %30, %cst_32 {dimension_numbers = #tpu.dot_dimension_numbers<[1], [0], [0], [1], [0, 0, 1, 1], [], []>} : vector<1x8xf32>, vector<8x128xf32>, vector<1x128xf32> -> vector<1x128xf32>
    %32 = arith.addf %29, %31 : vector<1x128xf32>
    %c0_33 = arith.constant 0 : index
    %c0_34 = arith.constant 0 : index
    %33 = vector.load %arg9[%c0_33, %c0_34] : memref<1x128xf32, #tpu.memory_space<vmem>>, vector<1x128xf32>
    tpu.vector_store %arg9[%c0_33, %c0_34], %32 {strides = array<i32>} : memref<1x128xf32, #tpu.memory_space<vmem>>, vector<1x128xf32>,
    %c0_35 = arith.constant 0 : index
    %c0_36 = arith.constant 0 : index
    %34 = vector.load %arg10[%c0_35, %c0_36] : memref<1x128xf32, #tpu.memory_space<vmem>>, vector<1x128xf32>
    %35 = arith.mulf %23, %23 : vector<8x128xf32>
    %cst_37 = arith.constant dense<0.000000e+00> : vector<1x128xf32>
    %36 = tpu.matmul %14, %35, %cst_37 {dimension_numbers = #tpu.dot_dimension_numbers<[1], [0], [0], [1], [0, 0, 1, 1], [], []>} : vector<1x8xf32>, vector<8x128xf32>, vector<1x128xf32> -> vector<1x128xf32>
    %37 = arith.addf %34, %36 : vector<1x128xf32>
    %c0_38 = arith.constant 0 : index
    %c0_39 = arith.constant 0 : index
    %38 = vector.load %arg10[%c0_38, %c0_39] : memref<1x128xf32, #tpu.memory_space<vmem>>, vector<1x128xf32>
    tpu.vector_store %arg10[%c0_38, %c0_39], %37 {strides = array<i32>} : memref<1x128xf32, #tpu.memory_space<vmem>>, vector<1x128xf32>,
    %c3_i32 = arith.constant 3 : i32
    %39 = arith.cmpi eq, %arg0, %c3_i32 : i32
    %40 = arith.extui %39 : i1 to i32
    %c0_i32_40 = arith.constant 0 : i32
    %41 = arith.cmpi ne, %40, %c0_i32_40 : i32
    scf.if %41 {
      %c0_41 = arith.constant 0 : index
      %c0_42 = arith.constant 0 : index
      %42 = vector.load %arg6[%c0_41, %c0_42] : memref<1x128xf32, #tpu.memory_space<vmem>>, vector<1x128xf32>
      %c0_43 = arith.constant 0 : index
      %c0_44 = arith.constant 0 : index
      %43 = vector.load %arg7[%c0_43, %c0_44] : memref<1x128xf32, #tpu.memory_space<vmem>>, vector<1x128xf32>
      %cst_45 = arith.constant 3.125000e-02 : f32
      %44 = vector.broadcast %cst_45 : f32 to vector<1x128xf32>
      %45 = arith.mulf %42, %44 : vector<1x128xf32>
      %cst_46 = arith.constant 3.125000e-02 : f32
      %46 = vector.broadcast %cst_46 : f32 to vector<1x128xf32>
      %47 = arith.mulf %43, %46 : vector<1x128xf32>
      %c0_47 = arith.constant 0 : index
      %c0_48 = arith.constant 0 : index
      %48 = vector.load %arg8[%c0_47, %c0_48] : memref<1x128xf32, #tpu.memory_space<vmem>>, vector<1x128xf32>
      %49 = arith.mulf %42, %45 : vector<1x128xf32>
      %50 = arith.subf %48, %49 : vector<1x128xf32>
      %cst_49 = arith.constant 0.0322580636 : f32
      %51 = vector.broadcast %cst_49 : f32 to vector<1x128xf32>
      %52 = arith.mulf %50, %51 : vector<1x128xf32>
      %c0_50 = arith.constant 0 : index
      %c0_51 = arith.constant 0 : index
      %53 = vector.load %arg9[%c0_50, %c0_51] : memref<1x128xf32, #tpu.memory_space<vmem>>, vector<1x128xf32>
      %54 = arith.mulf %43, %47 : vector<1x128xf32>
      %55 = arith.subf %53, %54 : vector<1x128xf32>
      %cst_52 = arith.constant 0.0322580636 : f32
      %56 = vector.broadcast %cst_52 : f32 to vector<1x128xf32>
      %57 = arith.mulf %55, %56 : vector<1x128xf32>
      %cst_53 = arith.constant 9.99999974E-5 : f32
      %58 = vector.broadcast %cst_53 : f32 to vector<1x128xf32>
      %59 = arith.addf %52, %58 : vector<1x128xf32>
      %60 = math.sqrt %59 : vector<1x128xf32>
      %cst_54 = arith.constant 9.99999974E-5 : f32
      %61 = vector.broadcast %cst_54 : f32 to vector<1x128xf32>
      %62 = arith.addf %57, %61 : vector<1x128xf32>
      %63 = math.sqrt %62 : vector<1x128xf32>
      %cst_55 = arith.constant 1.000000e+00 : f32
      %64 = vector.broadcast %cst_55 : f32 to vector<1x128xf32>
      %65 = arith.subf %64, %60 : vector<1x128xf32>
      %cst_56 = arith.constant 0.000000e+00 : f32
      %66 = vector.broadcast %cst_56 : f32 to vector<1x128xf32>
      %67 = arith.maximumf %65, %66 : vector<1x128xf32>
      %68 = vector.shape_cast %67 : vector<1x128xf32> to vector<1x1x128xf32>
      %cst_57 = arith.constant dense<0.000000e+00> : vector<1xf32>
      %69 = vector.multi_reduction <add>, %68, %cst_57 [1, 2] : vector<1x1x128xf32> to vector<1xf32>
      %70 = vector.shape_cast %69 : vector<1xf32> to vector<1x1x1xf32>
      %71 = vector.extract %70[0, 0, 0] : f32 from vector<1x1x1xf32>
      %cst_58 = arith.constant 1.000000e+00 : f32
      %72 = vector.broadcast %cst_58 : f32 to vector<1x128xf32>
      %73 = arith.subf %72, %63 : vector<1x128xf32>
      %cst_59 = arith.constant 0.000000e+00 : f32
      %74 = vector.broadcast %cst_59 : f32 to vector<1x128xf32>
      %75 = arith.maximumf %73, %74 : vector<1x128xf32>
      %76 = vector.shape_cast %75 : vector<1x128xf32> to vector<1x1x128xf32>
      %cst_60 = arith.constant dense<0.000000e+00> : vector<1xf32>
      %77 = vector.multi_reduction <add>, %76, %cst_60 [1, 2] : vector<1x1x128xf32> to vector<1xf32>
      %78 = vector.shape_cast %77 : vector<1xf32> to vector<1x1x1xf32>
      %79 = vector.extract %78[0, 0, 0] : f32 from vector<1x1x1xf32>
      %80 = arith.addf %71, %79 : f32
      %cst_61 = arith.constant 3.906250e-03 : f32
      %81 = arith.mulf %80, %cst_61 : f32
      %c0_62 = arith.constant 0 : index
      %c0_63 = arith.constant 0 : index
      %82 = vector.load %arg4[%c0_62, %c0_63] : memref<128x128xf32, #tpu.memory_space<vmem>>, vector<128x128xf32>
      %cst_64 = arith.constant dense<0.000000e+00> : vector<128x128xf32>
      %83 = tpu.matmul %42, %42, %cst_64 {dimension_numbers = #tpu.dot_dimension_numbers<[0], [0], [1], [1], [0, 1, 1, 1], [], []>} : vector<1x128xf32>, vector<1x128xf32>, vector<128x128xf32> -> vector<128x128xf32>
      %cst_65 = arith.constant 3.125000e-02 : f32
      %84 = vector.broadcast %cst_65 : f32 to vector<128x128xf32>
      %85 = arith.mulf %83, %84 : vector<128x128xf32>
      %86 = arith.subf %82, %85 : vector<128x128xf32>
      %cst_66 = arith.constant 0.0322580636 : f32
      %87 = vector.broadcast %cst_66 : f32 to vector<128x128xf32>
      %88 = arith.mulf %86, %87 : vector<128x128xf32>
      %c0_67 = arith.constant 0 : index
      %c0_68 = arith.constant 0 : index
      %89 = vector.load %arg5[%c0_67, %c0_68] : memref<128x128xf32, #tpu.memory_space<vmem>>, vector<128x128xf32>
      %cst_69 = arith.constant dense<0.000000e+00> : vector<128x128xf32>
      %90 = tpu.matmul %43, %43, %cst_69 {dimension_numbers = #tpu.dot_dimension_numbers<[0], [0], [1], [1], [0, 1, 1, 1], [], []>} : vector<1x128xf32>, vector<1x128xf32>, vector<128x128xf32> -> vector<128x128xf32>
      %cst_70 = arith.constant 3.125000e-02 : f32
      %91 = vector.broadcast %cst_70 : f32 to vector<128x128xf32>
      %92 = arith.mulf %90, %91 : vector<128x128xf32>
      %93 = arith.subf %89, %92 : vector<128x128xf32>
      %cst_71 = arith.constant 0.0322580636 : f32
      %94 = vector.broadcast %cst_71 : f32 to vector<128x128xf32>
      %95 = arith.mulf %93, %94 : vector<128x128xf32>
      %96 = arith.mulf %88, %88 : vector<128x128xf32>
      %97 = vector.shape_cast %96 : vector<128x128xf32> to vector<1x128x128xf32>
      %cst_72 = arith.constant dense<0.000000e+00> : vector<1xf32>
      %98 = vector.multi_reduction <add>, %97, %cst_72 [1, 2] : vector<1x128x128xf32> to vector<1xf32>
      %99 = vector.shape_cast %98 : vector<1xf32> to vector<1x1x1xf32>
      %100 = vector.extract %99[0, 0, 0] : f32 from vector<1x1x1xf32>
      %101 = arith.mulf %52, %52 : vector<1x128xf32>
      %102 = vector.shape_cast %101 : vector<1x128xf32> to vector<1x1x128xf32>
      %cst_73 = arith.constant dense<0.000000e+00> : vector<1xf32>
      %103 = vector.multi_reduction <add>, %102, %cst_73 [1, 2] : vector<1x1x128xf32> to vector<1xf32>
      %104 = vector.shape_cast %103 : vector<1xf32> to vector<1x1x1xf32>
      %105 = vector.extract %104[0, 0, 0] : f32 from vector<1x1x1xf32>
      %106 = arith.subf %100, %105 : f32
      %107 = arith.mulf %95, %95 : vector<128x128xf32>
      %108 = vector.shape_cast %107 : vector<128x128xf32> to vector<1x128x128xf32>
      %cst_74 = arith.constant dense<0.000000e+00> : vector<1xf32>
      %109 = vector.multi_reduction <add>, %108, %cst_74 [1, 2] : vector<1x128x128xf32> to vector<1xf32>
      %110 = vector.shape_cast %109 : vector<1xf32> to vector<1x1x1xf32>
      %111 = vector.extract %110[0, 0, 0] : f32 from vector<1x1x1xf32>
      %112 = arith.mulf %57, %57 : vector<1x128xf32>
      %113 = vector.shape_cast %112 : vector<1x128xf32> to vector<1x1x128xf32>
      %cst_75 = arith.constant dense<0.000000e+00> : vector<1xf32>
      %114 = vector.multi_reduction <add>, %113, %cst_75 [1, 2] : vector<1x1x128xf32> to vector<1xf32>
      %115 = vector.shape_cast %114 : vector<1xf32> to vector<1x1x1xf32>
      %116 = vector.extract %115[0, 0, 0] : f32 from vector<1x1x1xf32>
      %117 = arith.subf %111, %116 : f32
      %118 = arith.addf %106, %117 : f32
      %cst_76 = arith.constant 7.812500e-03 : f32
      %119 = arith.mulf %118, %cst_76 : f32
      %c0_77 = arith.constant 0 : index
      %c0_78 = arith.constant 0 : index
      %120 = vector.load %arg10[%c0_77, %c0_78] : memref<1x128xf32, #tpu.memory_space<vmem>>, vector<1x128xf32>
      %121 = vector.shape_cast %120 : vector<1x128xf32> to vector<1x1x128xf32>
      %cst_79 = arith.constant dense<0.000000e+00> : vector<1xf32>
      %122 = vector.multi_reduction <add>, %121, %cst_79 [1, 2] : vector<1x1x128xf32> to vector<1xf32>
      %123 = vector.shape_cast %122 : vector<1xf32> to vector<1x1x1xf32>
      %124 = vector.extract %123[0, 0, 0] : f32 from vector<1x1x1xf32>
      %cst_80 = arith.constant 2.44140625E-4 : f32
      %125 = arith.mulf %124, %cst_80 : f32
      %cst_81 = arith.constant 2.500000e+01 : f32
      %126 = arith.mulf %cst_81, %125 : f32
      %cst_82 = arith.constant 2.500000e+01 : f32
      %127 = arith.mulf %cst_82, %81 : f32
      %128 = arith.addf %126, %127 : f32
      %cst_83 = arith.constant 1.000000e+00 : f32
      %129 = arith.mulf %cst_83, %119 : f32
      %130 = arith.addf %128, %129 : f32
      %c0_84 = arith.constant 0 : index
      %c0_85 = arith.constant 0 : index
      %131 = memref.load %arg3[%c0_84, %c0_85] : memref<1x1xf32, #tpu.memory_space<smem>>
      memref.store %130, %arg3[%c0_84, %c0_85] : memref<1x1xf32, #tpu.memory_space<smem>>
    } else {
    }
    return
  }
  func.func @transform_0(%arg0: i32) -> (i32, i32) {
    %c0_i32 = arith.constant 0 : i32
    %c0_i32_0 = arith.constant 0 : i32
    return %arg0, %c0_i32 : i32, i32
  }
  func.func @transform_1(%arg0: i32) -> (i32, i32) {
    %c0_i32 = arith.constant 0 : i32
    %c0_i32_0 = arith.constant 0 : i32
    return %arg0, %c0_i32 : i32, i32
  }
  func.func @transform_2(%arg0: i32) -> (i32, i32) {
    %c0_i32 = arith.constant 0 : i32
    %c0_i32_0 = arith.constant 0 : i32
    %c0_i32_1 = arith.constant 0 : i32
    return %c0_i32, %c0_i32_0 : i32, i32
  }
}

</mosaic_0001>

<bundles_post_ra>
// kernel: tpu_custom_call.1
= control target key start
LH: loop header
LB: loop body
LE: loop exit
PB: predicated region body
PF: predicated region fallthrough
CT: control target
= control target key end

     0   :  { %7 = vsyncpa [#allocation10], 0  ;;  %s2793_s0 = inlined_call_operand.hbm [shape: f32[32,128], index: 0, kind: input, shape index: {}]   ;;  %s2794_s1 = inlined_call_operand.hbm [shape: f32[32,128], index: 1, kind: input, shape index: {}]   ;;  %s2795_s2 = inlined_call_operand.hbm [shape: f32[1,1], index: 2, kind: output, shape index: {}]  }
   0x1   :  { %9 = vsyncpa [#allocation10 + $0x1], 0 }
   0x2   :  { %10 = vsyncpa [#allocation13], 0 }
   0x3   :  { %12 = vsyncpa [#allocation13 + $0x1], 0 }
   0x4   :  { %13 = vsyncpa [#allocation11], 0  ;;  %s2499_s9 = smov 0   ;;  %s2501_s10 = smov 0  }
   0x5   :  { %s2503_s11 = smov 0   ;;  %s2505_s12 = smov 0  }
   0x6 LB: > { %s2518_s13 = sadd.s32 4294967295, %s2475_s12   ;;  %s2521_s14 = sadd.s32 1, %s2475_s12   ;;  %s2475_s12 = sphi %s2505_s12, %s2807_s12   ;;  %s2471_s11 = sphi %s2503_s11, %s2806_s11   ;;  %s2467_s10 = sphi %s2501_s10, %s2805_s10   ;;  %s2463_s9 = sphi %s2499_s9, %s2804_s9  }
   0x7   : > { %s23_s15 = ssub.s32 %s2475_s12, %s2521_s14  ;;  %s26_s16 = sadd.s32 1, %s2471_s11 }
   0x8   : > { %p24_p0 = scmp.eq.s32.totalorder %s23_s15, 0  ;;  %p33_p1 = scmp.ne.s32.totalorder %s2471_s11, %s2467_s10 }
   0x9   : > { %p34_p2 = scmp.eq.s32.totalorder %s2475_s12, 0  ;;  %p39_p3 = scmp.ne.s32.totalorder %s2467_s10, %s2463_s9 }
   0xa   : > { %s2531_s17 = scalar_select %p24_p0, %s2471_s11, %s26_s16  }
   0xb   : > { %p35_p4 = por %p34_p2, %p33_p1  ;;  %p40_p5 = scmp.eq.s32.totalorder %s2518_s13, 0 }
   0xc   : > { %p2316_p6 = scmp.lt.s32.totalorder %s2475_s12, 4  ;;  %s2540_s19 = sand.u32 1, %s2471_s11  }
   0xd   : > { %p2535_p7 = por %p40_p5, %p39_p3  ;;  %s1996_s20 = sshll.u32 %s2540_s19, 3 }
   0xe   : > { %s1997_s21 = sshll.u32 %s2475_s12, 7  ;;  %s114_s25 = scalar_lea.vmem [#allocation9], %s1996_s20 }
   0xf   : > { %s2797_s18 = scalar_select %p2535_p7, 1, 0 }
  0x10   : > { %s2549_s24 = scalar_lea.hbm %s2793_s0, %s1997_s21  ;;  %s121_s26 = sshll.u32 %s114_s25, 4  ;;  %s2553_s26 = int_to_ptr.vmem [resolvable:$true] %s121_s26 }
  0x11   : > { %p2555_p8 = pnand %p2316_p6, %p35_p4  ;;  %s111_s28 = scalar_lea.sflag [#allocation10], %s2540_s19 }
  0x12   : > { %s2361_s29 = scalar_lea.hbm %s2549_s24, 128  ;;  %s2366_s4 = scalar_lea.hbm %s2793_s0, 512 }
  0x13   : > { %p2362_p11 = scmp.ne.s32.totalorder %s2549_s24, %s2361_s29  ;;  %p2363_p12 = pneg %p2555_p8 }
  0x14   : > { %p2367_p1 = scmp.lt.u32.totalorder %s2549_s24, %s2793_s0  ;;  %p2368_p2 = scmp.lt.u32.totalorder %s2366_s4, %s2361_s29 }
  0x15   : > { %p2364_p13 = pnand %p2363_p12, %p2362_p11  ;;  %p2370_p4 = scmp.lt.u32.totalorder %s2361_s29, %s2549_s24 }
  0x16   : > { %p2369_p3 = por %p2368_p2, %p2367_p1 }
  0x17   : > { %p2365_p0 = pneg %p2364_p13 }
  0x18   : > { %p2371_p5 = por %p2370_p4, %p2369_p3 }
  0x1a   : > { %p2372_p6 = pnand %p2371_p5, %p2365_p0 }
  0x1c   : > { %2375 = shalt.err (!%p2372_p6)
}
  0x1d   : > { %s2376_s7 = scalar_lea.vmem %s2553_s26, 128  ;;  %s2477_s8 = smov [#allocation9]  }
  0x1e   : > { %p2377_p11 = scmp.ne.s32.totalorder %s2553_s26, %s2376_s7  ;;  %s2381_s9 = sshll.u32 %s2477_s8, 4  ;;  %s2382_s9 = int_to_ptr.vmem [resolvable:$false] %s2381_s9 }
  0x1f   : > { %s2383_s15 = scalar_lea.vmem %s2382_s9, 256  ;;  %p2384_p10 = scmp.lt.s32.totalorder %s2553_s26, %s2382_s9 }
  0x20   : > { %p2379_p13 = pnand %p2377_p11, %p2363_p12  ;;  %p2385_p1 = scmp.lt.s32.totalorder %s2383_s15, %s2376_s7 }
  0x22   : > { %p2380_p9 = pneg %p2379_p13  ;;  %p2386_p2 = por %p2385_p1, %p2384_p10 }
  0x24   : > { %p2387_p3 = pnand %p2386_p2, %p2380_p9 }
  0x26   : > { %2390 = shalt.err (!%p2387_p3)
}
  0x27   : > { %2312 = dma.hbm_to_vmem [thread:$0]  (!%p2555_p8), %s2549_s24, 128, %s2553_s26, %s111_s28  }
  0x28   : > { %p2799_p0 = scmp.lt.s32.totalorder %s2475_s12, 5  ;;  %p2800_p4 = scmp.ge.s32.totalorder %s2475_s12, 1 }
  0x29   : > { %s2600_s25 = scalar_lea.hbm %s2794_s1, %s1997_s21  ;;  %s132_s29 = scalar_lea.vmem [#allocation12], %s1996_s20 }
  0x2a   : > { %p2591_p5 = pnand %p2800_p4, %p2799_p0  ;;  %s139_s30 = sshll.u32 %s132_s29, 4  ;;  %s140_s30 = int_to_ptr.vmem [resolvable:$true] %s139_s30 }
  0x2b   : > { %s129_s24 = scalar_lea.sflag [#allocation13], %s2540_s19  ;;  %s2391_s26 = scalar_lea.hbm %s2600_s25, 128 }
  0x2c   : > { %s2801_s16 = scalar_select %p2591_p5, 1, 0 }
  0x2d   : > { %p2392_p9 = scmp.ne.s32.totalorder %s2600_s25, %s2391_s26  ;;  %s2396_s21 = scalar_lea.hbm %s2794_s1, 512 }
  0x2e   : > { %p2397_p11 = scmp.lt.u32.totalorder %s2600_s25, %s2794_s1  ;;  %p2398_p13 = scmp.lt.u32.totalorder %s2396_s21, %s2391_s26 }
  0x2f   : > { %p2394_p10 = pnand %p2392_p9, %p2363_p12  ;;  %p2400_p2 = scmp.lt.u32.totalorder %s2391_s26, %s2600_s25 }
  0x30   : > { %p2399_p1 = por %p2398_p13, %p2397_p11 }
  0x31   : > { %p2395_p6 = pneg %p2394_p10 }
  0x32   : > { %p2401_p3 = por %p2400_p2, %p2399_p1 }
  0x34   : > { %p2402_p0 = pnand %p2401_p3, %p2395_p6 }
  0x36   : > { %2405 = shalt.err (!%p2402_p0)
}
  0x37   : > { %s2406_s19 = scalar_lea.vmem %s140_s30, 128  ;;  %s2478_s20 = smov [#allocation12]  }
  0x38   : > { %p2407_p4 = scmp.ne.s32.totalorder %s140_s30, %s2406_s19  ;;  %s2411_s5 = sshll.u32 %s2478_s20, 4  ;;  %s2412_s5 = int_to_ptr.vmem [resolvable:$false] %s2411_s5 }
  0x39   : > { %s2413_s6 = scalar_lea.vmem %s2412_s5, 256  ;;  %p2414_p7 = scmp.lt.s32.totalorder %s140_s30, %s2412_s5 }
  0x3a   : > { %p2409_p9 = pnand %p2407_p4, %p2363_p12  ;;  %p2415_p5 = scmp.lt.s32.totalorder %s2413_s6, %s2406_s19 }
  0x3c   : > { %p2410_p10 = pneg %p2409_p9  ;;  %p2416_p11 = por %p2415_p5, %p2414_p7 }
  0x3e   : > { %p2417_p13 = pnand %p2416_p11, %p2410_p10 }
  0x40   : > { %2420 = shalt.err (!%p2417_p13)
}
  0x41   : > { %2315 = dma.hbm_to_vmem [thread:$0]  (!%p2555_p8), %s2600_s25, 128, %s140_s30, %s129_s24  }
  0x42   : > { %p2802_p6 = scmp.ne.s32.totalorder %s2801_s16, 0 }
  0x43   : > { %s150_s7 = sand.u32 (!%p2802_p6), 1, %s2467_s10   ;;  %p2803_p12 = scmp.ne.s32.totalorder (!%p2802_p6), %s2797_s18, 0 }
  0x44   : > { %148 = sbr.rel (%p2802_p6) target bundleno = 1225 (0x4c9), region = 28  ;;  %s2001_s8 = sshll.u32 (!%p2802_p6), %s150_s7, 3 }
  0x45   : > { %s151_s9 = scalar_lea.sflag (!%p2802_p6), [#allocation10], %s150_s7  ;;  %s2627_s15 = scalar_lea.vmem (!%p2802_p6), [#allocation9], %s2001_s8 }
  0x4b   : > { %2450 = dma.done.wait (%p2803_p12), %s151_s9, 128  }
  0x4c   : > { %2452 = vsyncadd (%p2803_p12), %s151_s9, 4294967168  ;;  %s160_s22 = scalar_lea.sflag [#allocation13], %s150_s7  ;;  %s2633_s27 = scalar_lea.vmem [#allocation12], %s2001_s8 }
  0x4d   : > { %2454 = dma.done.wait (%p2803_p12), %s160_s22, 128  }
  0x4e   : > { %2456 = vsyncadd (%p2803_p12), %s160_s22, 4294967168  ;;  %p2003_p7 = scmp.ne.s32.totalorder %s2518_s13, 0 }
  0x4f   : > { %v2479_v0 = vmov (!%p2003_p7), 0.0  }
  0x50   : > { %187 = sbr.rel (%p2003_p7) target bundleno = 99 (0x63), region = 40  ;;  %188 = vst [vmem:[#allocation2] sm:$0xff] (!%p2003_p7), %v2479_v0  ;;  %189 = vst [vmem:[#allocation2 + $0x8] sm:$0xff] (!%p2003_p7), %v2479_v0 }
  0x51   : > { %190 = vst [vmem:[#allocation2 + $0x10] sm:$0xff] (!%p2003_p7), %v2479_v0  ;;  %191 = vst [vmem:[#allocation2 + $0x18] sm:$0xff] (!%p2003_p7), %v2479_v0 }
  0x52   : > { %192 = vst [vmem:[#allocation2 + $0x20] sm:$0xff] (!%p2003_p7), %v2479_v0  ;;  %193 = vst [vmem:[#allocation2 + $0x28] sm:$0xff] (!%p2003_p7), %v2479_v0 }
  0x53   : > { %194 = vst [vmem:[#allocation2 + $0x30] sm:$0xff] (!%p2003_p7), %v2479_v0  ;;  %195 = vst [vmem:[#allocation2 + $0x38] sm:$0xff] (!%p2003_p7), %v2479_v0 }
  0x54   : > { %196 = vst [vmem:[#allocation2 + $0x40] sm:$0xff] (!%p2003_p7), %v2479_v0  ;;  %197 = vst [vmem:[#allocation2 + $0x48] sm:$0xff] (!%p2003_p7), %v2479_v0 }
  0x55   : > { %198 = vst [vmem:[#allocation2 + $0x50] sm:$0xff] (!%p2003_p7), %v2479_v0  ;;  %199 = vst [vmem:[#allocation2 + $0x58] sm:$0xff] (!%p2003_p7), %v2479_v0 }
  0x56   : > { %200 = vst [vmem:[#allocation2 + $0x60] sm:$0xff] (!%p2003_p7), %v2479_v0  ;;  %201 = vst [vmem:[#allocation2 + $0x68] sm:$0xff] (!%p2003_p7), %v2479_v0 }
  0x57   : > { %202 = vst [vmem:[#allocation2 + $0x70] sm:$0xff] %v2479_v0  ;;  %203 = vst [vmem:[#allocation2 + $0x78] sm:$0xff] %v2479_v0 }
  0x58   : > { %204 = vst [vmem:[#allocation3] sm:$0xff] %v2479_v0  ;;  %205 = vst [vmem:[#allocation3 + $0x8] sm:$0xff] %v2479_v0 }
  0x59   : > { %206 = vst [vmem:[#allocation3 + $0x10] sm:$0xff] %v2479_v0  ;;  %207 = vst [vmem:[#allocation3 + $0x18] sm:$0xff] %v2479_v0 }
  0x5a   : > { %208 = vst [vmem:[#allocation3 + $0x20] sm:$0xff] %v2479_v0  ;;  %209 = vst [vmem:[#allocation3 + $0x28] sm:$0xff] %v2479_v0 }
  0x5b   : > { %210 = vst [vmem:[#allocation3 + $0x30] sm:$0xff] %v2479_v0  ;;  %211 = vst [vmem:[#allocation3 + $0x38] sm:$0xff] %v2479_v0 }
  0x5c   : > { %212 = vst [vmem:[#allocation3 + $0x40] sm:$0xff] %v2479_v0  ;;  %213 = vst [vmem:[#allocation3 + $0x48] sm:$0xff] %v2479_v0 }
  0x5d   : > { %214 = vst [vmem:[#allocation3 + $0x50] sm:$0xff] %v2479_v0  ;;  %215 = vst [vmem:[#allocation3 + $0x58] sm:$0xff] %v2479_v0 }
  0x5e   : > { %216 = vst [vmem:[#allocation3 + $0x60] sm:$0xff] %v2479_v0  ;;  %217 = vst [vmem:[#allocation3 + $0x68] sm:$0xff] %v2479_v0 }
  0x5f   : > { %218 = vst [vmem:[#allocation3 + $0x70] sm:$0xff] %v2479_v0  ;;  %219 = vst [vmem:[#allocation3 + $0x78] sm:$0xff] %v2479_v0 }
  0x60   : > { %220 = vst [vmem:[#allocation4] sm:$0x1] %v2479_v0  ;;  %221 = vst [vmem:[#allocation5] sm:$0x1] %v2479_v0 }
  0x61   : > { %222 = vst [vmem:[#allocation6] sm:$0x1] %v2479_v0  ;;  %223 = vst [vmem:[#allocation7] sm:$0x1] %v2479_v0 }
  0x62   : > { %224 = vst [vmem:[#allocation8] sm:$0x1] %v2479_v0 }
  0x63 PF: > { %v225_v1 = vld [vmem:[%s2627_s15] sm:$0xff]  ;;  %v2642_v2 = vld [vmem:[%s2633_s27] sm:$0xff]  ;;  %v2480_v3 = vmov 0.0   ;;  %vm275_vm0 = vcmask 64512   ;;  %vm2481_vm1 = vmmov 0   ;;  %v2482_v23 = vmov 1.0  }
  0x64   : > { %243 = vxpose.xlu0.b32.start.end [1/1] (short) %v225_v1, 128  ;;  %2158 = vmatprep.subr.mxu0 %v225_v1  ;;  %v925_v20 = vmul.f32 %v225_v1, %v225_v1  ;;  %v923_v21 = vsub.f32 %v225_v1, %v2642_v2  ;;  %v999_v40 = vmul.f32 %v2642_v2, %v2642_v2  ;;  %v228_v41 = vld [vmem:[#allocation2 + $0x8] sm:$0xff]  ;;  %v227_v42 = vld [vmem:[#allocation2] sm:$0xff]  ;;  %v230_v47 = vld [vmem:[#allocation2 + $0x18] sm:$0xff]  ;;  %p2041_p8 = scmp.ne.s32.totalorder %s2518_s13, 3 }
  0x65   : > { %2159 = vmatpush3.msra.mxu0 %v225_v1  ;;  %2184 = vmatprep.subr.mxu1 %v2642_v2  ;;  %v229_v48 = vld [vmem:[#allocation2 + $0x10] sm:$0xff]  ;;  %v232_v53 = vld [vmem:[#allocation2 + $0x28] sm:$0xff]  ;;  %v231_v54 = vld [vmem:[#allocation2 + $0x20] sm:$0xff]  ;;  %vm1180_vm2 = vcmask (!%p2041_p8), 1040384   ;;  %vm1253_vm3 = vcmask (!%p2041_p8), 7168  }
  0x66   : > { %2185 = vmatpush3.msra.mxu1 %v2642_v2  ;;  %2210 = vmatprep.subr.mxu0 %v2480_v3  ;;  %v1073_v24 = vmul.f32 %v923_v21, %v923_v21  ;;  %v234_v59 = vld [vmem:[#allocation2 + $0x38] sm:$0xff]  ;;  %v233_v60 = vld [vmem:[#allocation2 + $0x30] sm:$0xff] }
  0x67   : > { %2215 = vmatprep.subr.mxu1 %v2480_v3 }
  0xa1   : > { %517 = vxpose.xlu0.b32.start.end [1/1] (short) %v2642_v2, 128 }
  0xe4   : > { %v259_v4 = vpop.trf.xlu0 }
  0xe5   : > { %2160 = vmatprep.mubr.msk.f32.mxu0 %vm275_vm0, %v259_v4 }
  0xe8   : > { %v260_v5 = vpop.trf.xlu0 }
  0xe9   : > { %2161 = vmatmul.mubr.msk.f32.vlgmr.msra.gmra.mrb[0].mxu0 %vm275_vm0, %v260_v5 }
  0xea   : > { %2211 = vmatpush3.msra.mxu0 %v225_v1  ;;  %v236_v1 = vld [vmem:[#allocation2 + $0x48] sm:$0xff] }
  0xeb   : > { %2220 = vmatprep.subr.mxu0 %v2480_v3 }
  0xec   : > { %v261_v6 = vpop.trf.xlu0 }
  0xed   : > { %2163 = vmatprep.mubr.msk.f32.mxu0 %vm275_vm0, %v261_v6 }
  0xf0   : > { %v262_v7 = vpop.trf.xlu0 }
  0xf1   : > { %2164 = vmatmul.mubr.msk.f32.gmra.mrb[2].mxu0 %vm275_vm0, %v262_v7  ;;  %v238_v7 = vld [vmem:[#allocation2 + $0x58] sm:$0xff] }
  0xf4   : > { %v263_v8 = vpop.trf.xlu0 }
  0xf5   : > { %2166 = vmatprep.mubr.msk.f32.mxu0 %vm275_vm0, %v263_v8  ;;  %v237_v8 = vld [vmem:[#allocation2 + $0x50] sm:$0xff] }
  0xf8   : > { %v264_v9 = vpop.trf.xlu0 }
  0xf9   : > { %2167 = vmatmul.mubr.msk.f32.gmra.mrb[4].mxu0 %vm275_vm0, %v264_v9 }
  0xfc   : > { %v265_v10 = vpop.trf.xlu0 }
  0xfd   : > { %2169 = vmatprep.mubr.msk.f32.mxu0 %vm275_vm0, %v265_v10 }
 0x100   : > { %v266_v11 = vpop.trf.xlu0 }
 0x101   : > { %2170 = vmatmul.mubr.msk.f32.gmra.mrb[6].mxu0 %vm275_vm0, %v266_v11 }
 0x104   : > { %v267_v12 = vpop.trf.xlu0 }
 0x105   : > { %2172 = vmatprep.mubr.msk.f32.mxu0 %vm275_vm0, %v267_v12 }
 0x108   : > { %v268_v13 = vpop.trf.xlu0 }
 0x109   : > { %2173 = vmatmul.mubr.msk.f32.gmra.mrb[8].mxu0 %vm275_vm0, %v268_v13  ;;  %v240_v13 = vld [vmem:[#allocation2 + $0x68] sm:$0xff] }
 0x10c   : > { %v269_v14 = vpop.trf.xlu0 }
 0x10d   : > { %2175 = vmatprep.mubr.msk.f32.mxu0 %vm275_vm0, %v269_v14  ;;  %v239_v14 = vld [vmem:[#allocation2 + $0x60] sm:$0xff] }
 0x110   : > { %v270_v15 = vpop.trf.xlu0 }
 0x111   : > { %2176 = vmatmul.mubr.msk.f32.gmra.mrb[10].mxu0 %vm275_vm0, %v270_v15 }
 0x114   : > { %v271_v16 = vpop.trf.xlu0 }
 0x115   : > { %2178 = vmatprep.mubr.msk.f32.mxu0 %vm275_vm0, %v271_v16 }
 0x118   : > { %v272_v17 = vpop.trf.xlu0 }
 0x119   : > { %2179 = vmatmul.mubr.msk.f32.gmra.mrb[12].mxu0 %vm275_vm0, %v272_v17 }
 0x11c   : > { %v273_v18 = vpop.trf.xlu0 }
 0x11d   : > { %2181 = vmatprep.mubr.msk.f32.mxu0 %vm275_vm0, %v273_v18 }
 0x120   : > { %v274_v19 = vpop.trf.xlu0 }
 0x121   : > { %2182 = vmatmul.mubr.msk.f32.gmra.mrb[14].mxu0 %vm275_vm0, %v274_v19  ;;  %v242_v19 = vld [vmem:[#allocation2 + $0x78] sm:$0xff] }
 0x122   : > { %2212 = vmatprep.mubr.msk.f32.mxu0 %vm2481_vm1, %v2480_v3 }
 0x124   : > { %v533_v22 = vpop.trf.xlu0 }
 0x125   : > { %2186 = vmatprep.mubr.msk.f32.mxu1 %vm275_vm0, %v533_v22  ;;  %2213 = vmatmul.mubr.msk.f32.vlgmr.msra.gmra.mrb[16].mxu0 %vm275_vm0, %v2482_v23 }
 0x126   : > { %2221 = vmatpush3.msra.mxu0 %v925_v20  ;;  %2222 = vmatprep.mubr.msk.f32.mxu0 %vm2481_vm1, %v2480_v3  ;;  %v241_v20 = vld [vmem:[#allocation2 + $0x70] sm:$0xff] }
 0x127   : > { %2230 = vmatprep.subr.mxu0 %v2480_v3 }
 0x128   : > { %v534_v25 = vpop.trf.xlu0 }
 0x129   : > { %2187 = vmatmul.mubr.msk.f32.vlgmr.msra.gmra.mrb[0].mxu1 %vm275_vm0, %v534_v25  ;;  %2223 = vmatmul.mubr.msk.f32.vlgmr.msra.gmra.mrb[18].mxu0 %vm275_vm0, %v2482_v23  ;;  %v774_v25 = vld [vmem:[#allocation4] sm:$0x1] }
 0x12a   : > { %2216 = vmatpush3.msra.mxu1 %v2642_v2  ;;  %2231 = vmatpush3.msra.mxu0 %v1073_v24  ;;  %v235_v2 = vld [vmem:[#allocation2 + $0x40] sm:$0xff] }
 0x12b   : > { %2225 = vmatprep.subr.mxu1 %v2480_v3  ;;  %2232 = vmatprep.mubr.msk.f32.mxu0 %vm2481_vm1, %v2480_v3 }
 0x12c   : > { %v535_v26 = vpop.trf.xlu0 }
 0x12d   : > { %2189 = vmatprep.mubr.msk.f32.mxu1 %vm275_vm0, %v535_v26  ;;  %2233 = vmatmul.mubr.msk.f32.vlgmr.msra.gmra.mrb[20].mxu0 %vm275_vm0, %v2482_v23 }
 0x130   : > { %v536_v27 = vpop.trf.xlu0 }
 0x131   : > { %2190 = vmatmul.mubr.msk.f32.gmra.mrb[2].mxu1 %vm275_vm0, %v536_v27 }
 0x134   : > { %v537_v28 = vpop.trf.xlu0 }
 0x135   : > { %2192 = vmatprep.mubr.msk.f32.mxu1 %vm275_vm0, %v537_v28 }
 0x138   : > { %v538_v29 = vpop.trf.xlu0 }
 0x139   : > { %2193 = vmatmul.mubr.msk.f32.gmra.mrb[4].mxu1 %vm275_vm0, %v538_v29  ;;  %v502_v29 = vld [vmem:[#allocation3 + $0x8] sm:$0xff] }
 0x13c   : > { %v539_v30 = vpop.trf.xlu0 }
 0x13d   : > { %2195 = vmatprep.mubr.msk.f32.mxu1 %vm275_vm0, %v539_v30  ;;  %v924_v30 = vld [vmem:[#allocation6] sm:$0x1] }
 0x140   : > { %v540_v31 = vpop.trf.xlu0 }
 0x141   : > { %2196 = vmatmul.mubr.msk.f32.gmra.mrb[6].mxu1 %vm275_vm0, %v540_v31  ;;  %v501_v31 = vld [vmem:[#allocation3] sm:$0xff] }
 0x144   : > { %v541_v32 = vpop.trf.xlu0 }
 0x145   : > { %2198 = vmatprep.mubr.msk.f32.mxu1 %vm275_vm0, %v541_v32 }
 0x148   : > { %v542_v33 = vpop.trf.xlu0 }
 0x149   : > { %2199 = vmatmul.mubr.msk.f32.gmra.mrb[8].mxu1 %vm275_vm0, %v542_v33 }
 0x14c   : > { %v543_v34 = vpop.trf.xlu0 }
 0x14d   : > { %2201 = vmatprep.mubr.msk.f32.mxu1 %vm275_vm0, %v543_v34 }
 0x150   : > { %v544_v35 = vpop.trf.xlu0 }
 0x151   : > { %2202 = vmatmul.mubr.msk.f32.gmra.mrb[10].mxu1 %vm275_vm0, %v544_v35 }
 0x154   : > { %v545_v36 = vpop.trf.xlu0 }
 0x155   : > { %2204 = vmatprep.mubr.msk.f32.mxu1 %vm275_vm0, %v545_v36 }
 0x158   : > { %v546_v37 = vpop.trf.xlu0 }
 0x159   : > { %2205 = vmatmul.mubr.msk.f32.gmra.mrb[12].mxu1 %vm275_vm0, %v546_v37 }
 0x15c   : > { %v547_v38 = vpop.trf.xlu0 }
 0x15d   : > { %2207 = vmatprep.mubr.msk.f32.mxu1 %vm275_vm0, %v547_v38 }
 0x160   : > { %v548_v39 = vpop.trf.xlu0 }
 0x161   : > { %2208 = vmatmul.mubr.msk.f32.gmra.mrb[14].mxu1 %vm275_vm0, %v548_v39  ;;  %v1072_v39 = vld [vmem:[#allocation8] sm:$0x1] }
 0x162   : > { %2217 = vmatprep.mubr.msk.f32.mxu1 %vm2481_vm1, %v2480_v3 }
 0x165   : > { %2218 = vmatmul.mubr.msk.f32.vlgmr.msra.gmra.mrb[16].mxu1 %vm275_vm0, %v2482_v23 }
 0x166   : > { %2226 = vmatpush3.msra.mxu1 %v999_v40  ;;  %2227 = vmatprep.mubr.msk.f32.mxu1 %vm2481_vm1, %v2480_v3 }
 0x169   : > { %2228 = vmatmul.mubr.msk.f32.vlgmr.msra.gmra.mrb[18].mxu1 %vm275_vm0, %v2482_v23 }
 0x1bc   : > { %v2162_v43 = vpop.f32.mrb[0].mxu0 }
 0x1bd   : > { %v470_v44 = vadd.f32 %v2162_v43, %v228_v41  ;;  %v390_v45 = vpop.f32.mrb[1].mxu0  ;;  %v504_v43 = vld [vmem:[#allocation3 + $0x18] sm:$0xff] }
 0x1be   : > { %v469_v46 = vadd.f32 %v390_v45, %v227_v42 }
 0x1bf   : > { %486 = vst [vmem:[#allocation2 + $0x8] sm:$0xff] %v470_v44  ;;  %v503_v44 = vld [vmem:[#allocation3 + $0x10] sm:$0xff] }
 0x1c0   : > { %485 = vst [vmem:[#allocation2] sm:$0xff] %v469_v46 }
 0x1c4   : > { %v2165_v49 = vpop.f32.mrb[2].mxu0 }
 0x1c5   : > { %v472_v50 = vadd.f32 %v2165_v49, %v230_v47  ;;  %v400_v51 = vpop.f32.mrb[3].mxu0  ;;  %v506_v49 = vld [vmem:[#allocation3 + $0x28] sm:$0xff] }
 0x1c6   : > { %v471_v52 = vadd.f32 %v400_v51, %v229_v48 }
 0x1c7   : > { %488 = vst [vmem:[#allocation2 + $0x18] sm:$0xff] %v472_v50  ;;  %v505_v50 = vld [vmem:[#allocation3 + $0x20] sm:$0xff] }
 0x1c8   : > { %487 = vst [vmem:[#allocation2 + $0x10] sm:$0xff] %v471_v52 }
 0x1cc   : > { %v2168_v55 = vpop.f32.mrb[4].mxu0 }
 0x1cd   : > { %v474_v56 = vadd.f32 %v2168_v55, %v232_v53  ;;  %v410_v57 = vpop.f32.mrb[5].mxu0  ;;  %v508_v55 = vld [vmem:[#allocation3 + $0x38] sm:$0xff] }
 0x1ce   : > { %v473_v58 = vadd.f32 %v410_v57, %v231_v54 }
 0x1cf   : > { %490 = vst [vmem:[#allocation2 + $0x28] sm:$0xff] %v474_v56  ;;  %v507_v56 = vld [vmem:[#allocation3 + $0x30] sm:$0xff] }
 0x1d0   : > { %489 = vst [vmem:[#allocation2 + $0x20] sm:$0xff] %v473_v58 }
 0x1d4   : > { %v2171_v61 = vpop.f32.mrb[6].mxu0 }
 0x1d5   : > { %v476_v62 = vadd.f32 %v2171_v61, %v234_v59  ;;  %v420_v63 = vpop.f32.mrb[7].mxu0  ;;  %v510_v61 = vld [vmem:[#allocation3 + $0x48] sm:$0xff] }
 0x1d6   : > { %v475_v0 = vadd.f32 %v420_v63, %v233_v60 }
 0x1d7   : > { %492 = vst [vmem:[#allocation2 + $0x38] sm:$0xff] %v476_v62  ;;  %v509_v62 = vld [vmem:[#allocation3 + $0x40] sm:$0xff] }
 0x1d8   : > { %491 = vst [vmem:[#allocation2 + $0x30] sm:$0xff] %v475_v0 }
 0x1dc   : > { %v2174_v3 = vpop.f32.mrb[8].mxu0 }
 0x1dd   : > { %v478_v4 = vadd.f32 %v2174_v3, %v236_v1  ;;  %v430_v5 = vpop.f32.mrb[9].mxu0  ;;  %v512_v3 = vld [vmem:[#allocation3 + $0x58] sm:$0xff] }
 0x1de   : > { %v477_v6 = vadd.f32 %v430_v5, %v235_v2 }
 0x1df   : > { %494 = vst [vmem:[#allocation2 + $0x48] sm:$0xff] %v478_v4  ;;  %v511_v4 = vld [vmem:[#allocation3 + $0x50] sm:$0xff] }
 0x1e0   : > { %493 = vst [vmem:[#allocation2 + $0x40] sm:$0xff] %v477_v6 }
 0x1e4   : > { %v2177_v9 = vpop.f32.mrb[10].mxu0 }
 0x1e5   : > { %v480_v10 = vadd.f32 %v2177_v9, %v238_v7  ;;  %v440_v11 = vpop.f32.mrb[11].mxu0  ;;  %v514_v9 = vld [vmem:[#allocation3 + $0x68] sm:$0xff] }
 0x1e6   : > { %v479_v12 = vadd.f32 %v440_v11, %v237_v8 }
 0x1e7   : > { %496 = vst [vmem:[#allocation2 + $0x58] sm:$0xff] %v480_v10  ;;  %v513_v10 = vld [vmem:[#allocation3 + $0x60] sm:$0xff] }
 0x1e8   : > { %495 = vst [vmem:[#allocation2 + $0x50] sm:$0xff] %v479_v12 }
 0x1ec   : > { %v2180_v15 = vpop.f32.mrb[12].mxu0 }
 0x1ed   : > { %v482_v16 = vadd.f32 %v2180_v15, %v240_v13  ;;  %v450_v17 = vpop.f32.mrb[13].mxu0  ;;  %v516_v15 = vld [vmem:[#allocation3 + $0x78] sm:$0xff] }
 0x1ee   : > { %v481_v18 = vadd.f32 %v450_v17, %v239_v14 }
 0x1ef   : > { %498 = vst [vmem:[#allocation2 + $0x68] sm:$0xff] %v482_v16  ;;  %v515_v16 = vld [vmem:[#allocation3 + $0x70] sm:$0xff] }
 0x1f0   : > { %497 = vst [vmem:[#allocation2 + $0x60] sm:$0xff] %v481_v18 }
 0x1f4   : > { %v2183_v21 = vpop.f32.mrb[14].mxu0 }
 0x1f5   : > { %v484_v22 = vadd.f32 %v2183_v21, %v242_v19  ;;  %v460_v23 = vpop.f32.mrb[15].mxu0  ;;  %v850_v21 = vld [vmem:[#allocation5] sm:$0x1] }
 0x1f6   : > { %v483_v24 = vadd.f32 %v460_v23, %v241_v20 }
 0x1f7   : > { %500 = vst [vmem:[#allocation2 + $0x78] sm:$0xff] %v484_v22 }
 0x1f8   : > { %499 = vst [vmem:[#allocation2 + $0x70] sm:$0xff] %v483_v24  ;;  %v844_v26 = vpop.f32.mrb[16].mxu0 }
 0x1f9   : > { %v848_v27 = vadd.f32 %v844_v26, %v774_v25  ;;  %v2214_v28 = vpop.f32.mrb[17].mxu0  ;;  %v998_v25 = vld [vmem:[#allocation7] sm:$0x1] }
 0x1fb   : > { %849 = vst [vmem:[#allocation4] sm:$0x1] %v848_v27 }
 0x1fc   : > { %v2188_v32 = vpop.f32.mrb[0].mxu1  ;;  %v992_v33 = vpop.f32.mrb[18].mxu0 }
 0x1fd   : > { %v743_v34 = vadd.f32 %v2188_v32, %v502_v29  ;;  %v663_v35 = vpop.f32.mrb[1].mxu1  ;;  %v996_v36 = vadd.f32 %v992_v33, %v924_v30  ;;  %v2224_v37 = vpop.f32.mrb[19].mxu0 }
 0x1fe   : > { %v742_v38 = vadd.f32 %v663_v35, %v501_v31 }
 0x1ff   : > { %759 = vst [vmem:[#allocation3 + $0x8] sm:$0xff] %v743_v34  ;;  %997 = vst [vmem:[#allocation6] sm:$0x1] %v996_v36 }
 0x200   : > { %758 = vst [vmem:[#allocation3] sm:$0xff] %v742_v38  ;;  %v1140_v40 = vpop.f32.mrb[20].mxu0 }
 0x201   : > { %v1144_v41 = vadd.f32 %v1140_v40, %v1072_v39  ;;  %v2234_v42 = vpop.f32.mrb[21].mxu0 }
 0x202   : > { %v2704_v29 = vld [vmem:[#allocation4] sm:$0x1] (!%p2041_p8) }
 0x203   : > { %1145 = vst [vmem:[#allocation8] sm:$0x1] %v1144_v41  ;;  %1221 = vxpose.xlu0.b32.start.end [1/1] (short) (!%p2041_p8), %v2704_v29, 128  ;;  %2235 = vmatprep.subr.msk.mxu0 (!%p2041_p8), %vm1180_vm2, %v2704_v29 }
 0x204   : > { %v2191_v45 = vpop.f32.mrb[2].mxu1  ;;  %2236 = vmatpush3.msk.msra.mxu0 (!%p2041_p8), %vm1180_vm2, %v2704_v29 }
 0x205   : > { %v745_v46 = vadd.f32 %v2191_v45, %v504_v43  ;;  %v673_v47 = vpop.f32.mrb[3].mxu1 }
 0x206   : > { %v744_v48 = vadd.f32 %v673_v47, %v503_v44 }
 0x207   : > { %761 = vst [vmem:[#allocation3 + $0x18] sm:$0xff] %v745_v46 }
 0x208   : > { %760 = vst [vmem:[#allocation3 + $0x10] sm:$0xff] %v744_v48 }
 0x20c   : > { %v2194_v51 = vpop.f32.mrb[4].mxu1 }
 0x20d   : > { %v747_v52 = vadd.f32 %v2194_v51, %v506_v49  ;;  %v683_v53 = vpop.f32.mrb[5].mxu1 }
 0x20e   : > { %v746_v54 = vadd.f32 %v683_v53, %v505_v50 }
 0x20f   : > { %763 = vst [vmem:[#allocation3 + $0x28] sm:$0xff] %v747_v52 }
 0x210   : > { %762 = vst [vmem:[#allocation3 + $0x20] sm:$0xff] %v746_v54 }
 0x214   : > { %v2197_v57 = vpop.f32.mrb[6].mxu1 }
 0x215   : > { %v749_v58 = vadd.f32 %v2197_v57, %v508_v55  ;;  %v693_v59 = vpop.f32.mrb[7].mxu1 }
 0x216   : > { %v748_v60 = vadd.f32 %v693_v59, %v507_v56 }
 0x217   : > { %765 = vst [vmem:[#allocation3 + $0x38] sm:$0xff] %v749_v58 }
 0x218   : > { %764 = vst [vmem:[#allocation3 + $0x30] sm:$0xff] %v748_v60 }
 0x21c   : > { %v2200_v63 = vpop.f32.mrb[8].mxu1 }
 0x21d   : > { %v751_v0 = vadd.f32 %v2200_v63, %v510_v61  ;;  %v703_v1 = vpop.f32.mrb[9].mxu1 }
 0x21e   : > { %v750_v2 = vadd.f32 %v703_v1, %v509_v62  ;;  %v1152_v62 = vmul.f32 (!%p2041_p8), 0.03125, %v2704_v29 }
 0x21f   : > { %767 = vst [vmem:[#allocation3 + $0x48] sm:$0xff] %v751_v0  ;;  %v1154_v0 = vld [vmem:[#allocation6] sm:$0x1] (!%p2041_p8) }
 0x220   : > { %766 = vst [vmem:[#allocation3 + $0x40] sm:$0xff] %v750_v2  ;;  %v1155_v63 = vmul.f32 (!%p2041_p8), %v1152_v62, %v2704_v29 }
 0x222   : > { %v1156_v2 = vsub.f32 (!%p2041_p8), %v1154_v0, %v1155_v63 }
 0x224   : > { %v2203_v5 = vpop.f32.mrb[10].mxu1 }
 0x225   : > { %v753_v6 = vadd.f32 %v2203_v5, %v512_v3  ;;  %v713_v7 = vpop.f32.mrb[11].mxu1 }
 0x226   : > { %v752_v8 = vadd.f32 %v713_v7, %v511_v4  ;;  %v1157_v4 = vmul.f32 (!%p2041_p8), 0.032258064, %v1156_v2 }
 0x227   : > { %769 = vst [vmem:[#allocation3 + $0x58] sm:$0xff] %v753_v6 }
 0x228   : > { %768 = vst [vmem:[#allocation3 + $0x50] sm:$0xff] %v752_v8  ;;  %v1162_v7 = vadd.f32 (!%p2041_p8), 0.0001, %v1157_v4 }
 0x22a   : > { %2357 = vrsqrt.f32 (!%p2041_p8), %v1162_v7  ;;  %vm1165_vm4 = vcmp.eq.f32.partialorder (!%p2041_p8), %v1162_v7, inf  ;;  %vm1167_vm5 = vcmp.eq.f32.partialorder (!%p2041_p8), %v1162_v7, 0.0 }
 0x22c   : > { %v2206_v11 = vpop.f32.mrb[12].mxu1 }
 0x22d   : > { %v755_v12 = vadd.f32 %v2206_v11, %v514_v9  ;;  %v723_v13 = vpop.f32.mrb[13].mxu1  ;;  %v1830_v11 = vmul.f32 (!%p2041_p8), %v1157_v4, %v1157_v4 }
 0x22e   : > { %v754_v14 = vadd.f32 %v723_v13, %v513_v10 }
 0x22f   : > { %771 = vst [vmem:[#allocation3 + $0x68] sm:$0xff] %v755_v12  ;;  %v1831_v13 = vsel (!%p2041_p8), %vm1180_vm2, %v1830_v11, 0.0 }
 0x230   : > { %770 = vst [vmem:[#allocation3 + $0x60] sm:$0xff] %v754_v14  ;;  %1832 = vadd.xlane.f32.xlu1 (!%p2041_p8), %v1831_v13 }
 0x234   : > { %v2209_v17 = vpop.f32.mrb[14].mxu1  ;;  %v2358_v12 = vpop.eup (!%p2041_p8), %2357 }
 0x235   : > { %v757_v18 = vadd.f32 %v2209_v17, %v516_v15  ;;  %v733_v19 = vpop.f32.mrb[15].mxu1  ;;  %v1164_v14 = vmul.f32 (!%p2041_p8), %v2358_v12, %v1162_v7  ;;  %v1168_v15 = vand.u32 (!%p2041_p8), 2147483648, %v1162_v7 }
 0x236   : > { %v756_v20 = vadd.f32 %v733_v19, %v515_v16 }
 0x237   : > { %773 = vst [vmem:[#allocation3 + $0x78] sm:$0xff] %v757_v18  ;;  %v1166_v17 = vsel (!%p2041_p8), %vm1165_vm4, %v1162_v7, %v1164_v14 }
 0x238   : > { %772 = vst [vmem:[#allocation3 + $0x70] sm:$0xff] %v756_v20  ;;  %v917_v22 = vpop.f32.mrb[16].mxu1  ;;  %v1169_v19 = vsel (!%p2041_p8), %vm1167_vm5, %v1168_v15, %v1166_v17 }
 0x239   : > { %v921_v23 = vadd.f32 %v917_v22, %v850_v21  ;;  %v2219_v24 = vpop.f32.mrb[17].mxu1  ;;  %1149 = sbr.rel (%p2041_p8) target bundleno = 1210 (0x4ba), region = 44  ;;  %v1178_v21 = vsub.f32 (!%p2041_p8), 1.0, %v1169_v19  ;;  %v1214_v19 = vld [vmem:[#allocation2 + $0x48] sm:$0xff] (!%p2041_p8) }
 0x23b   : > { %922 = vst [vmem:[#allocation5] sm:$0x1] %v921_v23  ;;  %v1179_v24 = vmax.f32 (!%p2041_p8), %v1178_v21, 0.0 }
 0x23c   : > { %v1066_v26 = vpop.f32.mrb[18].mxu1 }
 0x23d   : > { %v1070_v27 = vadd.f32 %v1066_v26, %v998_v25  ;;  %v2229_v28 = vpop.f32.mrb[19].mxu1 }
 0x23f   : > { %1071 = vst [vmem:[#allocation7] sm:$0x1] %v1070_v27  ;;  %v1181_v27 = vsel (!%p2041_p8), %vm1180_vm2, %v1179_v24, 0.0 }
 0x242   : > { %v2707_v30 = vld [vmem:[#allocation5] sm:$0x1] }
 0x243   : > { %2261 = vmatprep.subr.msk.mxu1 %vm1180_vm2, %v2707_v30  ;;  %1514 = vxpose.xlu0.b32.start.end [1/1] (short) %v2707_v30, 128  ;;  %v1153_v3 = vmul.f32 0.03125, %v2707_v30 }
 0x244   : > { %2262 = vmatpush3.msk.msra.mxu1 %vm1180_vm2, %v2707_v30 }
 0x245   : > { %v1159_v5 = vmul.f32 %v1153_v3, %v2707_v30 }
 0x246   : > { %v1158_v6 = vld [vmem:[#allocation7] sm:$0x1] }
 0x247   : > { %v1160_v8 = vsub.f32 %v1158_v6, %v1159_v5  ;;  %v1212_v5 = vld [vmem:[#allocation2 + $0x38] sm:$0xff] }
 0x249   : > { %v1161_v9 = vmul.f32 0.032258064, %v1160_v8  ;;  %v1211_v8 = vld [vmem:[#allocation2 + $0x30] sm:$0xff] }
 0x24b   : > { %v1170_v10 = vadd.f32 0.0001, %v1161_v9  ;;  %v1882_v16 = vmul.f32 %v1161_v9, %v1161_v9 }
 0x24d   : > { %2359 = vrsqrt.f32 %v1170_v10  ;;  %v1883_v20 = vsel %vm1180_vm2, %v1882_v16, 0.0  ;;  %vm1173_vm6 = vcmp.eq.f32.partialorder %v1170_v10, inf  ;;  %v1176_v23 = vand.u32 2147483648, %v1170_v10 }
 0x24e   : > { %1884 = vadd.xlane.f32.xlu1 %v1883_v20  ;;  %vm1175_vm7 = vcmp.eq.f32.partialorder %v1170_v10, 0.0 }
 0x252   : > { %1182 = vadd.xlane.f32.xlu1 %v1181_v27 }
 0x257   : > { %v2360_v18 = vpop.eup %2359 }
 0x258   : > { %v1172_v22 = vmul.f32 %v2360_v18, %v1170_v10 }
 0x25a   : > { %v1174_v25 = vsel %vm1173_vm6, %v1170_v10, %v1172_v22  ;;  %v1213_v22 = vld [vmem:[#allocation2 + $0x40] sm:$0xff] }
 0x25b   : > { %v1177_v26 = vsel %vm1175_vm7, %v1176_v23, %v1174_v25 }
 0x25c   : > { %v1191_v28 = vsub.f32 1.0, %v1177_v26 }
 0x25e   : > { %v1192_v29 = vmax.f32 %v1191_v28, 0.0 }
 0x260   : > { %v1193_v30 = vsel %vm1180_vm2, %v1192_v29, 0.0 }
 0x261   : > { %1194 = vadd.xlane.f32.xlu1 %v1193_v30 }
 0x283   : > { %v1237_v31 = vpop.trf.xlu0 }
 0x284   : > { %2237 = vmatprep.mubr.msk.f32.mxu0 %vm1253_vm3, %v1237_v31  ;;  %v1206_v31 = vld [vmem:[#allocation2 + $0x8] sm:$0xff] }
 0x287   : > { %v1238_v32 = vpop.trf.xlu0 }
 0x288   : > { %2238 = vmatmul.mubr.msk.f32.vlgmr.msra.gmra.mrb[0].mxu0 %vm1253_vm3, %v1238_v32 }
 0x28b   : > { %v1239_v33 = vpop.trf.xlu0 }
 0x28c   : > { %2240 = vmatprep.mubr.msk.f32.mxu0 %vm1253_vm3, %v1239_v33 }
 0x28f   : > { %v1240_v34 = vpop.trf.xlu0 }
 0x290   : > { %2241 = vmatmul.mubr.msk.f32.gmra.mrb[2].mxu0 %vm1253_vm3, %v1240_v34  ;;  %v1205_v34 = vld [vmem:[#allocation2] sm:$0xff] }
 0x293   : > { %v1241_v35 = vpop.trf.xlu0 }
 0x294   : > { %2243 = vmatprep.mubr.msk.f32.mxu0 %vm1253_vm3, %v1241_v35 }
 0x297   : > { %v1242_v36 = vpop.trf.xlu0 }
 0x298   : > { %2244 = vmatmul.mubr.msk.f32.gmra.mrb[4].mxu0 %vm1253_vm3, %v1242_v36 }
 0x29b   : > { %v1243_v37 = vpop.trf.xlu0 }
 0x29c   : > { %2246 = vmatprep.mubr.msk.f32.mxu0 %vm1253_vm3, %v1243_v37 }
 0x29f   : > { %v1244_v38 = vpop.trf.xlu0 }
 0x2a0   : > { %2247 = vmatmul.mubr.msk.f32.gmra.mrb[6].mxu0 %vm1253_vm3, %v1244_v38 }
 0x2a3   : > { %v1245_v39 = vpop.trf.xlu0 }
 0x2a4   : > { %2249 = vmatprep.mubr.msk.f32.mxu0 %vm1253_vm3, %v1245_v39 }
 0x2a7   : > { %v1246_v40 = vpop.trf.xlu0 }
 0x2a8   : > { %2250 = vmatmul.mubr.msk.f32.gmra.mrb[8].mxu0 %vm1253_vm3, %v1246_v40 }
 0x2ab   : > { %v1247_v41 = vpop.trf.xlu0 }
 0x2ac   : > { %2252 = vmatprep.mubr.msk.f32.mxu0 %vm1253_vm3, %v1247_v41 }
 0x2af   : > { %v1248_v42 = vpop.trf.xlu0 }
 0x2b0   : > { %2253 = vmatmul.mubr.msk.f32.gmra.mrb[10].mxu0 %vm1253_vm3, %v1248_v42 }
 0x2b3   : > { %v1249_v43 = vpop.trf.xlu0 }
 0x2b4   : > { %2255 = vmatprep.mubr.msk.f32.mxu0 %vm1253_vm3, %v1249_v43  ;;  %v1208_v43 = vld [vmem:[#allocation2 + $0x18] sm:$0xff] }
 0x2b7   : > { %v1250_v44 = vpop.trf.xlu0 }
 0x2b8   : > { %2256 = vmatmul.mubr.msk.f32.gmra.mrb[12].mxu0 %vm1253_vm3, %v1250_v44 }
 0x2bb   : > { %v1251_v45 = vpop.trf.xlu0 }
 0x2bc   : > { %2258 = vmatprep.mubr.msk.f32.mxu0 %vm1253_vm3, %v1251_v45 }
 0x2bf   : > { %v1252_v46 = vpop.trf.xlu0 }
 0x2c0   : > { %2259 = vmatmul.mubr.msk.f32.gmra.mrb[14].mxu0 %vm1253_vm3, %v1252_v46  ;;  %v1207_v46 = vld [vmem:[#allocation2 + $0x10] sm:$0xff] }
 0x2c3   : > { %v1530_v47 = vpop.trf.xlu0 }
 0x2c4   : > { %2263 = vmatprep.mubr.msk.f32.mxu1 %vm1253_vm3, %v1530_v47 }
 0x2c7   : > { %v1531_v48 = vpop.trf.xlu0 }
 0x2c8   : > { %2264 = vmatmul.mubr.msk.f32.vlgmr.msra.gmra.mrb[0].mxu1 %vm1253_vm3, %v1531_v48 }
 0x2cb   : > { %v1532_v49 = vpop.trf.xlu0 }
 0x2cc   : > { %2266 = vmatprep.mubr.msk.f32.mxu1 %vm1253_vm3, %v1532_v49 }
 0x2cf   : > { %v1533_v50 = vpop.trf.xlu0 }
 0x2d0   : > { %2267 = vmatmul.mubr.msk.f32.gmra.mrb[2].mxu1 %vm1253_vm3, %v1533_v50 }
 0x2d3   : > { %v1534_v51 = vpop.trf.xlu0 }
 0x2d4   : > { %2269 = vmatprep.mubr.msk.f32.mxu1 %vm1253_vm3, %v1534_v51 }
 0x2d7   : > { %v1535_v52 = vpop.trf.xlu0 }
 0x2d8   : > { %2270 = vmatmul.mubr.msk.f32.gmra.mrb[4].mxu1 %vm1253_vm3, %v1535_v52 }
 0x2db   : > { %v1536_v53 = vpop.trf.xlu0 }
 0x2dc   : > { %2272 = vmatprep.mubr.msk.f32.mxu1 %vm1253_vm3, %v1536_v53 }
 0x2df   : > { %v1537_v54 = vpop.trf.xlu0 }
 0x2e0   : > { %2273 = vmatmul.mubr.msk.f32.gmra.mrb[6].mxu1 %vm1253_vm3, %v1537_v54 }
 0x2e3   : > { %v1538_v55 = vpop.trf.xlu0 }
 0x2e4   : > { %2275 = vmatprep.mubr.msk.f32.mxu1 %vm1253_vm3, %v1538_v55  ;;  %v1210_v55 = vld [vmem:[#allocation2 + $0x28] sm:$0xff] }
 0x2e7   : > { %v1539_v56 = vpop.trf.xlu0 }
 0x2e8   : > { %2276 = vmatmul.mubr.msk.f32.gmra.mrb[8].mxu1 %vm1253_vm3, %v1539_v56 }
 0x2eb   : > { %v1540_v57 = vpop.trf.xlu0 }
 0x2ec   : > { %2278 = vmatprep.mubr.msk.f32.mxu1 %vm1253_vm3, %v1540_v57 }
 0x2ef   : > { %v1541_v58 = vpop.trf.xlu0 }
 0x2f0   : > { %2279 = vmatmul.mubr.msk.f32.gmra.mrb[10].mxu1 %vm1253_vm3, %v1541_v58  ;;  %v1209_v58 = vld [vmem:[#allocation2 + $0x20] sm:$0xff] }
 0x2f3   : > { %v1542_v59 = vpop.trf.xlu0 }
 0x2f4   : > { %2281 = vmatprep.mubr.msk.f32.mxu1 %vm1253_vm3, %v1542_v59 }
 0x2f7   : > { %v1543_v60 = vpop.trf.xlu0 }
 0x2f8   : > { %2282 = vmatmul.mubr.msk.f32.gmra.mrb[12].mxu1 %vm1253_vm3, %v1543_v60 }
 0x2fb   : > { %v1544_v61 = vpop.trf.xlu0 }
 0x2fc   : > { %2284 = vmatprep.mubr.msk.f32.mxu1 %vm1253_vm3, %v1544_v61 }
 0x2ff   : > { %v1545_v1 = vpop.trf.xlu0 }
 0x300   : > { %2285 = vmatmul.mubr.msk.f32.gmra.mrb[14].mxu1 %vm1253_vm3, %v1545_v1 }
 0x35b   : > { %v2239_v32 = vpop.f32.mrb[0].mxu0 }
 0x35c   : > { %v1451_v33 = vmul.f32 0.03125, %v2239_v32  ;;  %v1371_v35 = vpop.f32.mrb[1].mxu0 }
 0x35d   : > { %v1450_v36 = vmul.f32 0.03125, %v1371_v35 }
 0x35e   : > { %v1467_v37 = vsub.f32 %v1206_v31, %v1451_v33  ;;  %v1216_v33 = vld [vmem:[#allocation2 + $0x58] sm:$0xff] }
 0x35f   : > { %v1466_v38 = vsub.f32 %v1205_v34, %v1450_v36  ;;  %v1215_v36 = vld [vmem:[#allocation2 + $0x50] sm:$0xff] }
 0x360   : > { %v1483_v39 = vmul.f32 0.032258064, %v1467_v37 }
 0x361   : > { %v1482_v40 = vmul.f32 0.032258064, %v1466_v38 }
 0x362   : > { %v1791_v41 = vmul.f32 %v1483_v39, %v1483_v39 }
 0x363   : > { %v1790_v42 = vmul.f32 %v1482_v40, %v1482_v40  ;;  %v2242_v44 = vpop.f32.mrb[2].mxu0 }
 0x364   : > { %v1453_v45 = vmul.f32 0.03125, %v2242_v44  ;;  %v1381_v47 = vpop.f32.mrb[3].mxu0 }
 0x365   : > { %v1806_v48 = vadd.f32 %v1791_v41, %v1790_v42  ;;  %v1452_v49 = vmul.f32 0.03125, %v1381_v47  ;;  %v1218_v47 = vld [vmem:[#allocation2 + $0x68] sm:$0xff] }
 0x366   : > { %v1469_v50 = vsub.f32 %v1208_v43, %v1453_v45 }
 0x367   : > { %v1468_v51 = vsub.f32 %v1207_v46, %v1452_v49 }
 0x368   : > { %v1485_v52 = vmul.f32 0.032258064, %v1469_v50  ;;  %v1217_v50 = vld [vmem:[#allocation2 + $0x60] sm:$0xff] }
 0x369   : > { %v1484_v53 = vmul.f32 0.032258064, %v1468_v51 }
 0x36a   : > { %v1793_v60 = vmul.f32 %v1485_v52, %v1485_v52 }
 0x36b   : > { %v1792_v54 = vmul.f32 %v1484_v53, %v1484_v53  ;;  %v2245_v56 = vpop.f32.mrb[4].mxu0 }
 0x36c   : > { %v1455_v57 = vmul.f32 0.03125, %v2245_v56  ;;  %v1391_v59 = vpop.f32.mrb[5].mxu0 }
 0x36d   : > { %v1807_v61 = vadd.f32 %v1806_v48, %v1792_v54  ;;  %v1454_v62 = vmul.f32 0.03125, %v1391_v59 }
 0x36e   : > { %v1471_v63 = vsub.f32 %v1210_v55, %v1455_v57 }
 0x36f   : > { %v1470_v0 = vsub.f32 %v1209_v58, %v1454_v62  ;;  %v1808_v1 = vadd.f32 %v1807_v61, %v1793_v60  ;;  %v1220_v61 = vld [vmem:[#allocation2 + $0x78] sm:$0xff] }
 0x370   : > { %v1487_v2 = vmul.f32 0.032258064, %v1471_v63 }
 0x371   : > { %v1486_v3 = vmul.f32 0.032258064, %v1470_v0  ;;  %v1219_v0 = vld [vmem:[#allocation2 + $0x70] sm:$0xff] }
 0x372   : > { %v1795_v10 = vmul.f32 %v1487_v2, %v1487_v2 }
 0x373   : > { %v1794_v4 = vmul.f32 %v1486_v3, %v1486_v3  ;;  %v2248_v6 = vpop.f32.mrb[6].mxu0 }
 0x374   : > { %v1457_v7 = vmul.f32 0.03125, %v2248_v6  ;;  %v1401_v9 = vpop.f32.mrb[7].mxu0 }
 0x375   : > { %v1809_v11 = vadd.f32 %v1808_v1, %v1794_v4  ;;  %v1456_v12 = vmul.f32 0.03125, %v1401_v9 }
 0x376   : > { %v1473_v13 = vsub.f32 %v1212_v5, %v1457_v7 }
 0x377   : > { %v1472_v14 = vsub.f32 %v1211_v8, %v1456_v12  ;;  %v1810_v15 = vadd.f32 %v1809_v11, %v1795_v10  ;;  %v1499_v11 = vld [vmem:[#allocation3 + $0x8] sm:$0xff] }
 0x378   : > { %v1489_v16 = vmul.f32 0.032258064, %v1473_v13 }
 0x379   : > { %v1488_v17 = vmul.f32 0.032258064, %v1472_v14  ;;  %v1498_v14 = vld [vmem:[#allocation3] sm:$0xff] }
 0x37a   : > { %v1797_v24 = vmul.f32 %v1489_v16, %v1489_v16 }
 0x37b   : > { %v1796_v18 = vmul.f32 %v1488_v17, %v1488_v17  ;;  %v2251_v20 = vpop.f32.mrb[8].mxu0 }
 0x37c   : > { %v1459_v21 = vmul.f32 0.03125, %v2251_v20  ;;  %v1411_v23 = vpop.f32.mrb[9].mxu0  ;;  %v2758_v20 = vpop.xlane.xlu1 %1832 }
 0x37d   : > { %v1811_v25 = vadd.f32 %v1810_v15, %v1796_v18  ;;  %v1458_v26 = vmul.f32 0.03125, %v1411_v23 }
 0x37e   : > { %v1475_v27 = vsub.f32 %v1214_v19, %v1459_v21 }
 0x37f   : > { %v1474_v28 = vsub.f32 %v1213_v22, %v1458_v26  ;;  %v1812_v29 = vadd.f32 %v1811_v25, %v1797_v24 }
 0x380   : > { %v1491_v30 = vmul.f32 0.032258064, %v1475_v27  ;;  %v2760_v26 = vpop.xlane.xlu1 %1884 }
 0x381   : > { %v1490_v31 = vmul.f32 0.032258064, %v1474_v28  ;;  %v1501_v28 = vld [vmem:[#allocation3 + $0x18] sm:$0xff] }
 0x382   : > { %v1799_v38 = vmul.f32 %v1491_v30, %v1491_v30 }
 0x383   : > { %v1798_v32 = vmul.f32 %v1490_v31, %v1490_v31  ;;  %v2254_v34 = vpop.f32.mrb[10].mxu0  ;;  %v1500_v31 = vld [vmem:[#allocation3 + $0x10] sm:$0xff] }
 0x384   : > { %v1461_v35 = vmul.f32 0.03125, %v2254_v34  ;;  %v1421_v37 = vpop.f32.mrb[11].mxu0 }
 0x385   : > { %v1813_v39 = vadd.f32 %v1812_v29, %v1798_v32  ;;  %v1460_v40 = vmul.f32 0.03125, %v1421_v37 }
 0x386   : > { %v1477_v41 = vsub.f32 %v1216_v33, %v1461_v35 }
 0x387   : > { %v1476_v42 = vsub.f32 %v1215_v36, %v1460_v40  ;;  %v1814_v43 = vadd.f32 %v1813_v39, %v1799_v38  ;;  %v1183_v36 = vpop.xlane.xlu1 %1182 }
 0x388   : > { %v1493_v44 = vmul.f32 0.032258064, %v1477_v41  ;;  %v1184_v38 = vrot.slane %v1183_v36, 4 }
 0x389   : > { %v1492_v45 = vmul.f32 0.032258064, %v1476_v42 }
 0x38a   : > { %v1801_v52 = vmul.f32 %v1493_v44, %v1493_v44 }
 0x38b   : > { %v1800_v46 = vmul.f32 %v1492_v45, %v1492_v45  ;;  %v2257_v48 = vpop.f32.mrb[12].mxu0  ;;  %v1195_v41 = vpop.xlane.xlu1 %1194  ;;  %v1185_v45 = vadd.f32 %v1184_v38, %v1183_v36 }
 0x38c   : > { %v1463_v49 = vmul.f32 0.03125, %v2257_v48  ;;  %v1431_v51 = vpop.f32.mrb[13].mxu0  ;;  %v1502_v48 = vld [vmem:[#allocation3 + $0x20] sm:$0xff] }
 0x38d   : > { %v1815_v53 = vadd.f32 %v1814_v43, %v1800_v46  ;;  %v1462_v54 = vmul.f32 0.03125, %v1431_v51  ;;  %v1503_v43 = vld [vmem:[#allocation3 + $0x28] sm:$0xff]  ;;  %v1196_v46 = vrot.slane %v1195_v41, 4 }
 0x38e   : > { %v1479_v55 = vsub.f32 %v1218_v47, %v1463_v49 }
 0x38f   : > { %v1478_v56 = vsub.f32 %v1217_v50, %v1462_v54  ;;  %v1816_v57 = vadd.f32 %v1815_v53, %v1801_v52  ;;  %v1197_v53 = vadd.f32 %v1196_v46, %v1195_v41 }
 0x390   : > { %v1495_v58 = vmul.f32 0.032258064, %v1479_v55 }
 0x391   : > { %v1494_v59 = vmul.f32 0.032258064, %v1478_v56 }
 0x392   : > { %v1803_v2 = vmul.f32 %v1495_v58, %v1495_v58  ;;  %v1198_v58 = vrot.slane %v1197_v53, 2 }
 0x393   : > { %v1802_v60 = vmul.f32 %v1494_v59, %v1494_v59  ;;  %v2260_v62 = vpop.f32.mrb[14].mxu0 }
 0x394   : > { %v1465_v63 = vmul.f32 0.03125, %v2260_v62  ;;  %v1441_v1 = vpop.f32.mrb[15].mxu0  ;;  %v1505_v62 = vld [vmem:[#allocation3 + $0x38] sm:$0xff] }
 0x395   : > { %v1817_v3 = vadd.f32 %v1816_v57, %v1802_v60  ;;  %v1464_v4 = vmul.f32 0.03125, %v1441_v1  ;;  %v1186_v57 = vrot.slane %v1185_v45, 2  ;;  %v1199_v1 = vadd.f32 %v1198_v58, %v1197_v53 }
 0x396   : > { %v1481_v5 = vsub.f32 %v1220_v61, %v1465_v63 }
 0x397   : > { %v1480_v6 = vsub.f32 %v1219_v0, %v1464_v4  ;;  %v1818_v7 = vadd.f32 %v1817_v3, %v1803_v2  ;;  %v1187_v0 = vadd.f32 %v1186_v57, %v1185_v45  ;;  %v1504_v4 = vld [vmem:[#allocation3 + $0x30] sm:$0xff] }
 0x398   : > { %v1497_v8 = vmul.f32 0.032258064, %v1481_v5 }
 0x399   : > { %v1496_v9 = vmul.f32 0.032258064, %v1480_v6 }
 0x39a   : > { %v1805_v17 = vmul.f32 %v1497_v8, %v1497_v8  ;;  %v1188_v8 = vrot.slane %v1187_v0, 1 }
 0x39b   : > { %v1804_v10 = vmul.f32 %v1496_v9, %v1496_v9  ;;  %v2265_v12 = vpop.f32.mrb[0].mxu1  ;;  %v1200_v9 = vrot.slane %v1199_v1, 1 }
 0x39c   : > { %v1743_v13 = vmul.f32 0.03125, %v2265_v12  ;;  %v1663_v15 = vpop.f32.mrb[1].mxu1 }
 0x39d   : > { %v1742_v16 = vmul.f32 0.03125, %v1663_v15  ;;  %v1819_v18 = vadd.f32 %v1818_v7, %v1804_v10 }
 0x39e   : > { %v1759_v19 = vsub.f32 %v1499_v11, %v1743_v13  ;;  %v1189_v13 = vadd.f32 %v1188_v8, %v1187_v0 }
 0x39f   : > { %v1758_v21 = vsub.f32 %v1498_v14, %v1742_v16  ;;  %v1820_v22 = vadd.f32 %v1819_v18, %v1805_v17  ;;  %v1201_v14 = vadd.f32 %v1200_v9, %v1199_v1  ;;  %v1507_v18 = vld [vmem:[#allocation3 + $0x48] sm:$0xff]  ;;  %v1512_v1 = vld [vmem:[#allocation3 + $0x70] sm:$0xff] }
 0x3a0   : > { %v1775_v23 = vmul.f32 0.032258064, %v1759_v19  ;;  %2287 = vpush %v1189_v13 }
 0x3a1   : > { %v1774_v24 = vmul.f32 0.032258064, %v1758_v21  ;;  %1821 = vadd.xlane.f32.xlu1 %v1820_v22  ;;  %2289 = vpush %v1201_v14  ;;  %v1506_v22 = vld [vmem:[#allocation3 + $0x40] sm:$0xff] }
 0x3a2   : > { %v1843_v25 = vmul.f32 %v1775_v23, %v1775_v23 }
 0x3a3   : > { %v1842_v27 = vmul.f32 %v1774_v24, %v1774_v24  ;;  %v2268_v29 = vpop.f32.mrb[2].mxu1 }
 0x3a4   : > { %v1745_v30 = vmul.f32 0.03125, %v2268_v29  ;;  %v1673_v32 = vpop.f32.mrb[3].mxu1 }
 0x3a5   : > { %v1858_v33 = vadd.f32 %v1843_v25, %v1842_v27  ;;  %v1744_v34 = vmul.f32 0.03125, %v1673_v32 }
 0x3a6   : > { %v1761_v35 = vsub.f32 %v1501_v28, %v1745_v30 }
 0x3a7   : > { %v1760_v37 = vsub.f32 %v1500_v31, %v1744_v34  ;;  %v1509_v34 = vld [vmem:[#allocation3 + $0x58] sm:$0xff] }
 0x3a8   : > { %v1777_v39 = vmul.f32 0.032258064, %v1761_v35 }
 0x3a9   : > { %v1776_v40 = vmul.f32 0.032258064, %v1760_v37  ;;  %v1508_v37 = vld [vmem:[#allocation3 + $0x50] sm:$0xff] }
 0x3aa   : > { %v1845_v50 = vmul.f32 %v1777_v39, %v1777_v39 }
 0x3ab   : > { %v1844_v42 = vmul.f32 %v1776_v40, %v1776_v40  ;;  %v2271_v44 = vpop.f32.mrb[4].mxu1 }
 0x3ac   : > { %v1747_v47 = vmul.f32 0.03125, %v2271_v44  ;;  %v1683_v49 = vpop.f32.mrb[5].mxu1 }
 0x3ad   : > { %v1859_v51 = vadd.f32 %v1858_v33, %v1844_v42  ;;  %v1746_v52 = vmul.f32 0.03125, %v1683_v49 }
 0x3ae   : > { %v1763_v54 = vsub.f32 %v1503_v43, %v1747_v47 }
 0x3af   : > { %v1762_v55 = vsub.f32 %v1502_v48, %v1746_v52  ;;  %v1860_v56 = vadd.f32 %v1859_v51, %v1845_v50  ;;  %v1511_v48 = vld [vmem:[#allocation3 + $0x68] sm:$0xff]  ;;  %v1510_v51 = vld [vmem:[#allocation3 + $0x60] sm:$0xff] }
 0x3b0   : > { %v1779_v59 = vmul.f32 0.032258064, %v1763_v54 }
 0x3b1   : > { %v1778_v60 = vmul.f32 0.032258064, %v1762_v55 }
 0x3b2   : > { %v1847_v2 = vmul.f32 %v1779_v59, %v1779_v59 }
 0x3b3   : > { %v1846_v61 = vmul.f32 %v1778_v60, %v1778_v60  ;;  %v2274_v63 = vpop.f32.mrb[6].mxu1 }
 0x3b4   : > { %v1749_v3 = vmul.f32 0.03125, %v2274_v63  ;;  %v1693_v5 = vpop.f32.mrb[7].mxu1 }
 0x3b5   : > { %v1861_v6 = vadd.f32 %v1860_v56, %v1846_v61  ;;  %v1748_v7 = vmul.f32 0.03125, %v1693_v5 }
 0x3b6   : > { %v1765_v10 = vsub.f32 %v1505_v62, %v1749_v3  ;;  %v1513_v62 = vld [vmem:[#allocation3 + $0x78] sm:$0xff] }
 0x3b7   : > { %v1764_v11 = vsub.f32 %v1504_v4, %v1748_v7  ;;  %v1862_v12 = vadd.f32 %v1861_v6, %v1847_v2 }
 0x3b8   : > { %v1781_v15 = vmul.f32 0.032258064, %v1765_v10 }
 0x3b9   : > { %v1780_v16 = vmul.f32 0.032258064, %v1764_v11 }
 0x3ba   : > { %v1849_v24 = vmul.f32 %v1781_v15, %v1781_v15  ;;  %v1896_v15 = vld [vmem:[#allocation8] sm:$0x1] }
 0x3bb   : > { %v1848_v17 = vmul.f32 %v1780_v16, %v1780_v16  ;;  %v2277_v19 = vpop.f32.mrb[8].mxu1  ;;  %v1897_v16 = vsel %vm1180_vm2, %v1896_v15, 0.0 }
 0x3bc   : > { %v1751_v21 = vmul.f32 0.03125, %v2277_v19  ;;  %v1703_v23 = vpop.f32.mrb[9].mxu1 }
 0x3bd   : > { %v1863_v25 = vadd.f32 %v1862_v12, %v1848_v17  ;;  %v1750_v27 = vmul.f32 0.03125, %v1703_v23  ;;  %v1834_v17 = vrot.slane %v2758_v20, 4 }
 0x3be   : > { %v1767_v28 = vsub.f32 %v1507_v18, %v1751_v21 }
 0x3bf   : > { %v1766_v29 = vsub.f32 %v1506_v22, %v1750_v27  ;;  %v1864_v30 = vadd.f32 %v1863_v25, %v1849_v24  ;;  %v1835_v18 = vadd.f32 %v1834_v17, %v2758_v20 }
 0x3c0   : > { %v1783_v31 = vmul.f32 0.032258064, %v1767_v28 }
 0x3c1   : > { %v1782_v32 = vmul.f32 0.032258064, %v1766_v29  ;;  %v1836_v19 = vrot.slane %v1835_v18, 2 }
 0x3c2   : > { %v1851_v39 = vmul.f32 %v1783_v31, %v1783_v31 }
 0x3c3   : > { %v1850_v33 = vmul.f32 %v1782_v32, %v1782_v32  ;;  %v2280_v35 = vpop.f32.mrb[10].mxu1  ;;  %v1837_v23 = vadd.f32 %v1836_v19, %v1835_v18  ;;  %v1886_v32 = vrot.slane %v2760_v26, 4 }
 0x3c4   : > { %v1753_v36 = vmul.f32 0.03125, %v2280_v35  ;;  %v1713_v38 = vpop.f32.mrb[11].mxu1 }
 0x3c5   : > { %v1865_v40 = vadd.f32 %v1864_v30, %v1850_v33  ;;  %v1752_v41 = vmul.f32 0.03125, %v1713_v38  ;;  %v1838_v27 = vrot.slane %v1837_v23, 1  ;;  %v1887_v33 = vadd.f32 %v1886_v32, %v2760_v26 }
 0x3c6   : > { %v1769_v42 = vsub.f32 %v1509_v34, %v1753_v36 }
 0x3c7   : > { %v1768_v43 = vsub.f32 %v1508_v37, %v1752_v41  ;;  %v1866_v44 = vadd.f32 %v1865_v40, %v1851_v39  ;;  %v1839_v30 = vadd.f32 %v1838_v27, %v1837_v23  ;;  %v1888_v34 = vrot.slane %v1887_v33, 2 }
 0x3c8   : > { %v1785_v45 = vmul.f32 0.032258064, %v1769_v42 }
 0x3c9   : > { %v1784_v46 = vmul.f32 0.032258064, %v1768_v43  ;;  %v1889_v38 = vadd.f32 %v1888_v34, %v1887_v33 }
 0x3ca   : > { %v1853_v53 = vmul.f32 %v1785_v45, %v1785_v45 }
 0x3cb   : > { %v1852_v47 = vmul.f32 %v1784_v46, %v1784_v46  ;;  %v2283_v49 = vpop.f32.mrb[12].mxu1  ;;  %v1890_v43 = vrot.slane %v1889_v38, 1 }
 0x3cc   : > { %v1755_v50 = vmul.f32 0.03125, %v2283_v49  ;;  %v1723_v52 = vpop.f32.mrb[13].mxu1 }
 0x3cd   : > { %v1867_v54 = vadd.f32 %v1866_v44, %v1852_v47  ;;  %v1754_v55 = vmul.f32 0.03125, %v1723_v52 }
 0x3ce   : > { %v1771_v56 = vsub.f32 %v1511_v48, %v1755_v50  ;;  %v1891_v48 = vadd.f32 %v1890_v43, %v1889_v38 }
 0x3cf   : > { %v1770_v57 = vsub.f32 %v1510_v51, %v1754_v55  ;;  %v1868_v58 = vadd.f32 %v1867_v54, %v1853_v53 }
 0x3d0   : > { %v1787_v59 = vmul.f32 0.032258064, %v1771_v56 }
 0x3d1   : > { %v1786_v60 = vmul.f32 0.032258064, %v1770_v57  ;;  %s2288_s18 = spop %2287 }
 0x3d2   : > { %v1855_v3 = vmul.f32 %v1787_v59, %v1787_v59  ;;  %s2290_s16 = spop %2289 }
 0x3d3   : > { %v1854_v61 = vmul.f32 %v1786_v60, %v1786_v60  ;;  %v2286_v63 = vpop.f32.mrb[14].mxu1  ;;  %s1203_s25 = sadd.f32 %s2290_s16, %s2288_s18 }
 0x3d4   : > { %v1757_v0 = vmul.f32 0.03125, %v2286_v63  ;;  %v1733_v2 = vpop.f32.mrb[15].mxu1 }
 0x3d5   : > { %v1869_v4 = vadd.f32 %v1868_v58, %v1854_v61  ;;  %v1756_v5 = vmul.f32 0.03125, %v1733_v2  ;;  %s1204_s26 = smul.f32 0.00390625, %s1203_s25 }
 0x3d6   : > { %v1773_v6 = vsub.f32 %v1513_v62, %v1757_v0 }
 0x3d7   : > { %v1772_v7 = vsub.f32 %v1512_v1, %v1756_v5  ;;  %v1870_v8 = vadd.f32 %v1869_v4, %v1855_v3  ;;  %s1909_s19 = smul.f32 25.0, %s1204_s26 }
 0x3d8   : > { %v1789_v9 = vmul.f32 0.032258064, %v1773_v6 }
 0x3d9   : > { %v1788_v10 = vmul.f32 0.032258064, %v1772_v7 }
 0x3da   : > { %v1857_v12 = vmul.f32 %v1789_v9, %v1789_v9 }
 0x3db   : > { %v1856_v11 = vmul.f32 %v1788_v10, %v1788_v10 }
 0x3dd   : > { %v1871_v13 = vadd.f32 %v1870_v8, %v1856_v11 }
 0x3df   : > { %v1872_v14 = vadd.f32 %v1871_v13, %v1857_v12 }
 0x3e1   : > { %1873 = vadd.xlane.f32.xlu1 %v1872_v14 }
 0x3e5   : > { %1898 = vadd.xlane.f32.xlu1 %v1897_v16 }
 0x42e   : > { %v1822_v21 = vpop.xlane.xlu1 %1821 }
 0x42f   : > { %v1823_v22 = vrot.slane %v1822_v21, 4 }
 0x431   : > { %v1824_v24 = vadd.f32 %v1823_v22, %v1822_v21 }
 0x433   : > { %v1825_v25 = vrot.slane %v1824_v24, 2 }
 0x435   : > { %v1826_v28 = vadd.f32 %v1825_v25, %v1824_v24 }
 0x437   : > { %v1827_v29 = vrot.slane %v1826_v28, 1 }
 0x439   : > { %v1828_v31 = vadd.f32 %v1827_v29, %v1826_v28 }
 0x43b   : > { %2291 = vpush %v1828_v31 }
 0x43c   : > { %2293 = vpush %v1839_v30 }
 0x46c   : > { %s2292_s23 = spop %2291 }
 0x46d   : > { %s2294_s29 = spop %2293 }
 0x46e   : > { %v1874_v35 = vpop.xlane.xlu1 %1873  ;;  %s1841_s28 = ssub.f32 %s2292_s23, %s2294_s29 }
 0x46f   : > { %v1875_v20 = vrot.slane %v1874_v35, 4 }
 0x471   : > { %v1876_v36 = vadd.f32 %v1875_v20, %v1874_v35 }
 0x472   : > { %v1899_v37 = vpop.xlane.xlu1 %1898 }
 0x473   : > { %v1877_v39 = vrot.slane %v1876_v36, 2  ;;  %v1900_v40 = vrot.slane %v1899_v37, 4 }
 0x475   : > { %v1901_v41 = vadd.f32 %v1900_v40, %v1899_v37  ;;  %v1878_v42 = vadd.f32 %v1877_v39, %v1876_v36 }
 0x477   : > { %v1902_v44 = vrot.slane %v1901_v41, 2  ;;  %v1879_v45 = vrot.slane %v1878_v42, 1 }
 0x479   : > { %v1903_v46 = vadd.f32 %v1902_v44, %v1901_v41  ;;  %v1880_v47 = vadd.f32 %v1879_v45, %v1878_v42 }
 0x47b   : > { %2295 = vpush %v1880_v47  ;;  %v1904_v49 = vrot.slane %v1903_v46, 1 }
 0x47c   : > { %2297 = vpush %v1891_v48 }
 0x47d   : > { %v1905_v26 = vadd.f32 %v1904_v49, %v1903_v46 }
 0x47f   : > { %2299 = vpush %v1905_v26 }
 0x4ac   : > { %s2296_s30 = spop %2295 }
 0x4ad   : > { %s2298_s24 = spop %2297 }
 0x4ae   : > { %s1893_s12 = ssub.f32 %s2296_s30, %s2298_s24 }
 0x4b0   : > { %s2300_s21 = spop %2299  ;;  %s1894_s3 = sadd.f32 %s1893_s12, %s1841_s28 }
 0x4b1   : > { %s1907_s4 = smul.f32 0.00024414063, %s2300_s21 }
 0x4b2   : > { %s1895_s5 = smul.f32 0.0078125, %s1894_s3 }
 0x4b3   : > { %s1908_s20 = smul.f32 25.0, %s1907_s4 }
 0x4b5   : > { %s1910_s6 = sadd.f32 %s1909_s19, %s1908_s20 }
 0x4b7   : > { %s1911_s7 = sadd.f32 %s1910_s6, %s1895_s5 }
 0x4b9   : > { %1913 = sst [smem:[#allocation14]] %s1911_s7 }
 0x4ba PF: > { %p2317_p5 = scmp.eq.s32.totalorder %s2518_s13, 3  ;;  %s2421_s15 = scalar_lea.hbm %s2795_s2, 16 }
 0x4bb   : > { %p2422_p1 = scmp.ne.s32.totalorder %s2795_s2, %s2421_s15  ;;  %p2427_p0 = scmp.lt.u32.totalorder %s2421_s15, %s2795_s2 }
 0x4bd   : > { %p2423_p2 = pnand %p2422_p1, %p2317_p5 }
 0x4bf   : > { %p2424_p3 = pneg %p2423_p2 }
 0x4c1   : > { %p2429_p4 = pnand %p2427_p0, %p2424_p3 }
 0x4c3   : > { %2432 = shalt.err (!%p2429_p4)
}
 0x4c4   : > { %s2483_s23 = smov [#allocation14]  }
 0x4c5   : > { %2306 = dma.smem_to_hbm (%p2317_p5), %s2483_s23, 16, %s2795_s2, [#allocation11]  }
 0x4c6   : > { %2458 = dma.done.wait (%p2317_p5), [#allocation11], 16  }
 0x4c7   : > { %2460 = vsyncadd (%p2317_p5), [#allocation11], 4294967280 }
 0x4c8   : > { %1927 = sfence }
 0x4c9 PF: > { %p16_p9 = scmp.ge.s32.totalorder %s2521_s14, 6   ;;  %s2804_s9 = smov %s2467_s10 }
 0x4ca   : > { %s2805_s10 = smov %s2471_s11  ;;  %s2806_s11 = smov %s2531_s17 }
 0x4cb   : > { %s2807_s12 = smov %s2521_s14  ;;  %18 = sbr.rel (!%p16_p9) target bundleno = 6 (0x6), region = 87 }
 0x4d2   :  { %1933 = vsyncpa [#allocation10], 1 }
 0x4d3   :  { %1935 = vsyncpa [#allocation10 + $0x1], 1 }
 0x4d4   :  { %1936 = vsyncpa [#allocation13], 1 }
 0x4d5   :  { %1938 = vsyncpa [#allocation13 + $0x1], 1 }
 0x4d6   :  { %1939 = vsyncpa [#allocation11], 1 }
 0x4d7   :  { %1941 = vsyncpa [#allocation11 + $0x1], 1 }

</bundles_post_ra>
